<compile_context>
chip_gen: v5e
topology: v5e:2x2
jax: 0.10.0
libtpu: 0.0.40
codegen_flags: <defaults>
</compile_context>

<pallas_src>
import functools

import jax
import jax.numpy as jnp
import numpy as np
from jax.experimental import pallas as pl
from jax.experimental.pallas import tpu as pltpu

OPT = dict(
    game_nagents=3,
    game_comm_bits=4,
    game_action_space=5,
    game_action_space_total=6,
    model_rnn_size=32,
    model_rnn_layers=2,
    model_action_aware=True,
    model_dial=True,
    comm_enabled=True,
    model_bn=False,
    model_comm_narrow=True,
)

HP = 128   # padded hidden width (one full f32 vreg of lanes)
GP = 128   # per-GRU-gate column group width: columns are [r | z | n_x | n_h], each 128
AP = 128   # padded action-logit width (A=6 -> 128, sliced back by the caller)
NE = 16    # one-hot rows of the fused input weight (3 agent + 2 state + 6 action, padded)
KIN = 32   # fused input contraction dim: [one-hot rows (NE) | comm bits (C) | pad]


def switch_cnet_kernel(aid_ref, sid_ref, uid_ref, msg_ref,
                       w_in_ref, b_in_ref,
                       w_gx_ref, w_gh_ref, b_gru_ref, h0_ref,
                       w_o1_ref, b_o1_ref, w_o2_ref, b_o2_ref,
                       h_out_ref, q_out_ref, *, h):
    L, B, hp = h0_ref.shape
    kin = msg_ref.shape[1]

    # ---- fused embedding lookups + message MLP: ONE MXU matmul.
    # Selector = sum of three one-hots (robust even if index ranges were to overlap);
    # message bits are pre-placed at columns [NE:NE+C) of msg_ref, so LHS = sel + msg.
    iota = jax.lax.broadcasted_iota(jnp.int32, (B, kin), 1)
    sel = ((iota == aid_ref[...]).astype(jnp.float32)
           + (iota == sid_ref[...]).astype(jnp.float32)
           + (iota == uid_ref[...]).astype(jnp.float32))
    lhs0 = sel + msg_ref[...]                                            # (B, KIN)
    g0 = jnp.dot(lhs0, w_in_ref[...],
                 preferred_element_type=jnp.float32) + b_in_ref[...]     # (B, 2*HP)
    # column group 0 = z_a + z_o + z_u, column group 1 = msg @ W + b (pre-ReLU)
    x = g0[:, 0:hp] + jnp.maximum(g0[:, hp:2 * hp], 0.0)                 # (B, HP)

    # ---- multi-layer GRU, one cell step per layer.
    # Row-compacted weights: contraction dim is the logical h (=32), not the padded 128,
    # so only x[:, :h] / h_prev[:, :h] feed the MXU (offset-0 lane slices, no shuffles).
    # Gate column groups stay 128 wide -> whole-vreg gate slices and lane-dense stores.
    for l in range(L):
        h_prev = h0_ref[l]                                               # (B, HP)
        gx = jnp.dot(x[:, 0:h], w_gx_ref[l], preferred_element_type=jnp.float32)
        gh = jnp.dot(h_prev[:, 0:h], w_gh_ref[l], preferred_element_type=jnp.float32)
        g = gx + gh + b_gru_ref[l]                                       # (B, 4*GP)
        r = jax.nn.sigmoid(g[:, 0:GP])
        zg = jax.nn.sigmoid(g[:, GP:2 * GP])
        n = jnp.tanh(g[:, 2 * GP:3 * GP] + r * g[:, 3 * GP:4 * GP])      # torch GRU n-gate
        h_new = (1.0 - zg) * n + zg * h_prev
        h_out_ref[l] = h_new                                             # lane-dense store
        x = h_new

    # ---- output head: Linear(H,H) -> ReLU -> Linear(H,A), row-compacted weights.
    o1 = jnp.maximum(
        jnp.dot(x[:, 0:h], w_o1_ref[...], preferred_element_type=jnp.float32)
        + b_o1_ref[...], 0.0)                                            # (B, HP)
    q_out_ref[...] = (jnp.dot(o1[:, 0:h], w_o2_ref[...],
                              preferred_element_type=jnp.float32)
                      + b_o2_ref[...])                                   # (B, AP)


def init_params(key, opt):
    """Logical (unpadded) parameters, matching the torch module's shapes/init range."""
    H = opt['model_rnn_size']
    C = opt['game_comm_bits']
    A = opt['game_action_space_total']
    L = opt['model_rnn_layers']
    lo, hi = -0.08, 0.08
    ks = jax.random.split(key, 13)
    u = lambda k, shape: jax.random.uniform(k, shape, jnp.float32, lo, hi)
    return dict(
        agent_emb=u(ks[0], (opt['game_nagents'], H)),
        state_emb=u(ks[1], (2, H)),
        action_emb=u(ks[2], (A, H)),            # model_dial=True -> size A
        w_msg=u(ks[3], (C, H)), b_msg=u(ks[4], (1, H)),
        w_ih=u(ks[5], (L, H, 3 * H)), w_hh=u(ks[6], (L, H, 3 * H)),
        b_ih=u(ks[7], (L, 1, 3 * H)), b_hh=u(ks[8], (L, 1, 3 * H)),
        w_o1=u(ks[9], (H, H)), b_o1=u(ks[10], (1, H)),
        w_o2=u(ks[11], (H, A)), b_o2=u(ks[12], (1, A)),
    )


def pack_params(params, opt):
    """Pack/pad logical params into the lane-aligned, row-compacted kernel layout."""
    H = opt['model_rnn_size']
    C = opt['game_comm_bits']
    A = opt['game_action_space_total']
    L = opt['model_rnn_layers']
    NAg = opt['game_nagents']

    # Fused input weight (KIN, 2*HP): one-hot rows [0:NE) feed column group 0 (embedding
    # sum), message rows [NE:NE+C) feed column group 1 (message MLP pre-activation).
    w_in = jnp.zeros((KIN, 2 * HP), jnp.float32)
    w_in = w_in.at[0:NAg, 0:H].set(params['agent_emb'])
    w_in = w_in.at[NAg:NAg + 2, 0:H].set(params['state_emb'])
    w_in = w_in.at[NAg + 2:NAg + 2 + A, 0:H].set(params['action_emb'])
    w_in = w_in.at[NE:NE + C, HP:HP + H].set(params['w_msg'])
    b_in = jnp.zeros((1, 2 * HP), jnp.float32).at[0, HP:HP + H].set(params['b_msg'][0])

    # Row-compacted GRU weights: (L, H, 4*GP) each for the x and h contributions.
    # Columns: [0:GP) r | [GP:2GP) z | [2GP:3GP) n_x | [3GP:4GP) n_h (torch order r,z,n);
    # n_x / n_h stay separate so r multiplies only the hidden part incl. b_hn.
    w_gx = jnp.zeros((L, H, 4 * GP), jnp.float32)
    w_gh = jnp.zeros((L, H, 4 * GP), jnp.float32)
    b_gru = jnp.zeros((L, 1, 4 * GP), jnp.float32)
    for l in range(L):
        wih, whh = params['w_ih'][l], params['w_hh'][l]            # (H, 3H)
        bih, bhh = params['b_ih'][l][0], params['b_hh'][l][0]      # (3H,)
        # r gate
        w_gx = w_gx.at[l, :, 0:H].set(wih[:, 0:H])
        w_gh = w_gh.at[l, :, 0:H].set(whh[:, 0:H])
        b_gru = b_gru.at[l, 0, 0:H].set(bih[0:H] + bhh[0:H])
        # z gate
        w_gx = w_gx.at[l, :, GP:GP + H].set(wih[:, H:2 * H])
        w_gh = w_gh.at[l, :, GP:GP + H].set(whh[:, H:2 * H])
        b_gru = b_gru.at[l, 0, GP:GP + H].set(bih[H:2 * H] + bhh[H:2 * H])
        # n gate, x part (b_in stays outside the r multiply)
        w_gx = w_gx.at[l, :, 2 * GP:2 * GP + H].set(wih[:, 2 * H:3 * H])
        b_gru = b_gru.at[l, 0, 2 * GP:2 * GP + H].set(bih[2 * H:3 * H])
        # n gate, h part (b_hn stays inside the r multiply)
        w_gh = w_gh.at[l, :, 3 * GP:3 * GP + H].set(whh[:, 2 * H:3 * H])
        b_gru = b_gru.at[l, 0, 3 * GP:3 * GP + H].set(bhh[2 * H:3 * H])

    # Row-compacted output head.
    w_o1 = jnp.zeros((H, HP), jnp.float32).at[:, :H].set(params['w_o1'])
    b_o1 = jnp.zeros((1, HP), jnp.float32).at[:, :H].set(params['b_o1'])
    w_o2 = jnp.zeros((H, AP), jnp.float32).at[:, :A].set(params['w_o2'])
    b_o2 = jnp.zeros((1, AP), jnp.float32).at[:, :A].set(params['b_o2'])

    return dict(w_in=w_in, b_in=b_in, w_gx=w_gx, w_gh=w_gh, b_gru=b_gru,
                w_o1=w_o1, b_o1=b_o1, w_o2=w_o2, b_o2=b_o2)


def pad_hidden(hidden):
    """Pad the logical (L, B, H) GRU state to the lane-dense (L, B, 128) carried layout."""
    L, B, H = hidden.shape
    return jnp.pad(hidden.astype(jnp.float32), ((0, 0), (0, 0), (0, HP - H)))


def switch_cnet_forward(packed, s_t, messages, hidden_p, prev_action, agent_index, *, opt):
    """One SwitchCNet step.  `hidden_p` is the padded (L, B, 128) GRU state; the returned
    state uses the same padded layout (padded lanes provably stay exactly 0), so it can
    be fed straight back on the next step with no pad/slice round trip.  The state is
    updated in place via input_output_aliases (donate it under jit for true aliasing)."""
    H = opt['model_rnn_size']
    C = opt['game_comm_bits']
    NAg = opt['game_nagents']
    L, B, _ = hidden_p.shape

    # Row indices into the fused one-hot rows (agent | state | prev_action) and the
    # lane-placed message bits (columns [NE:NE+C) of a (B, KIN) slab).
    aid = agent_index.astype(jnp.int32).reshape(B, 1)
    sid = (s_t.astype(jnp.int32) + NAg).reshape(B, 1)
    uid = (prev_action.astype(jnp.int32) + NAg + 2).reshape(B, 1)
    msg = jnp.zeros((B, KIN), jnp.float32).at[:, NE:NE + C].set(
        messages.reshape(-1, C).astype(jnp.float32))

    vm = pl.BlockSpec(memory_space=pltpu.MemorySpace.VMEM)
    h_out_p, q_p = pl.pallas_call(
        functools.partial(switch_cnet_kernel, h=H),
        out_shape=(jax.ShapeDtypeStruct((L, B, HP), jnp.float32),
                   jax.ShapeDtypeStruct((B, AP), jnp.float32)),
        in_specs=[vm] * 14,
        out_specs=(vm, vm),
        input_output_aliases={9: 0},   # padded GRU state (input 9) updated in place
    )(aid, sid, uid, msg,
      packed['w_in'], packed['b_in'],
      packed['w_gx'], packed['w_gh'], packed['b_gru'], hidden_p,
      packed['w_o1'], packed['b_o1'], packed['w_o2'], packed['b_o2'])

    return h_out_p, q_p


def reference_forward(params, s_t, messages, hidden, prev_action, agent_index, opt):
    """Pure-JAX reference mirroring torch semantics (GRU gate order r,z,n)."""
    H = opt['model_rnn_size']
    L = opt['model_rnn_layers']
    z_pre = (params['agent_emb'][agent_index] + params['state_emb'][s_t]
             + params['action_emb'][prev_action])
    z_m = jnp.maximum(
        messages.reshape(-1, opt['game_comm_bits']) @ params['w_msg']
        + params['b_msg'], 0.0)
    x = z_pre + z_m
    hs = []
    for l in range(L):
        h_prev = hidden[l]
        gi = x @ params['w_ih'][l] + params['b_ih'][l]
        gh = h_prev @ params['w_hh'][l] + params['b_hh'][l]
        r = jax.nn.sigmoid(gi[:, :H] + gh[:, :H])
        zg = jax.nn.sigmoid(gi[:, H:2 * H] + gh[:, H:2 * H])
        n = jnp.tanh(gi[:, 2 * H:] + r * gh[:, 2 * H:])
        h_new = (1.0 - zg) * n + zg * h_prev
        hs.append(h_new)
        x = h_new
    o1 = jnp.maximum(x @ params['w_o1'] + params['b_o1'], 0.0)
    q = o1 @ params['w_o2'] + params['b_o2']
    return jnp.stack(hs), q


if __name__ == "__main__":
    opt = OPT
    H = opt['model_rnn_size']
    L = opt['model_rnn_layers']
    A = opt['game_action_space_total']
    C = opt['game_comm_bits']
    n_envs = 8
    B = n_envs * opt['game_nagents']   # flatten envs x agents into one MXU batch (24 rows)

    root = jax.random.PRNGKey(0)
    kp, k1, k2, k3, k4 = jax.random.split(root, 5)
    params = init_params(kp, opt)
    packed = pack_params(params, opt)

    s_t = jax.random.randint(k1, (B,), 0, 2)
    messages = jax.random.uniform(k2, (B, C), jnp.float32)
    hidden = 0.05 * jax.random.normal(k3, (L, B, H), jnp.float32)
    prev_action = jax.random.randint(k4, (B,), 0, A)
    agent_index = jnp.tile(jnp.arange(opt['game_nagents'], dtype=jnp.int32), n_envs)

    hidden_p = pad_hidden(hidden)      # pad ONCE; the padded state is what gets carried

    fwd = jax.jit(functools.partial(switch_cnet_forward, opt=opt),
                  donate_argnums=(3,))   # donate the carried state so aliasing is real
    h_out_p, q_p = fwd(packed, s_t, messages, hidden_p, prev_action, agent_index)
    jax.block_until_ready((h_out_p, q_p))

    h_ref, q_ref = reference_forward(
        params, s_t, messages, hidden, prev_action, agent_index, opt)
    np.testing.assert_allclose(np.asarray(h_out_p[:, :, :H]), np.asarray(h_ref),
                               rtol=1e-5, atol=1e-5)
    np.testing.assert_allclose(np.asarray(q_p[:, :A]), np.asarray(q_ref),
                               rtol=1e-5, atol=1e-5)
    # Padded lanes of the carried state stay exactly 0 -> safe to feed straight back.
    np.testing.assert_array_equal(np.asarray(h_out_p[:, :, H:]), 0.0)
    print("KERNEL_OK")
</pallas_src>

<mosaic_0001>
module attributes {stable_mosaic.version = 11 : i64} {
  func.func @switch_cnet_kernel(%arg0: memref<24x1xi32, #tpu.memory_space<vmem>>, %arg1: memref<24x1xi32, #tpu.memory_space<vmem>>, %arg2: memref<24x1xi32, #tpu.memory_space<vmem>>, %arg3: memref<24x32xf32, #tpu.memory_space<vmem>>, %arg4: memref<32x256xf32, #tpu.memory_space<vmem>>, %arg5: memref<1x256xf32, #tpu.memory_space<vmem>>, %arg6: memref<2x32x512xf32, #tpu.memory_space<vmem>>, %arg7: memref<2x32x512xf32, #tpu.memory_space<vmem>>, %arg8: memref<2x1x512xf32, #tpu.memory_space<vmem>>, %arg9: memref<2x24x128xf32, #tpu.memory_space<vmem>>, %arg10: memref<32x128xf32, #tpu.memory_space<vmem>>, %arg11: memref<1x128xf32, #tpu.memory_space<vmem>>, %arg12: memref<32x128xf32, #tpu.memory_space<vmem>>, %arg13: memref<1x128xf32, #tpu.memory_space<vmem>>, %arg14: memref<2x24x128xf32, #tpu.memory_space<vmem>>, %arg15: memref<24x128xf32, #tpu.memory_space<vmem>>) attributes {dimension_semantics = [], scalar_prefetch = 0 : i64, scratch_operands = 0 : i64, tpu.core_type = #tpu.core_type<tc>} {
    %0 = tpu.iota {dimensions = array<i32: 1>} : vector<24x32xi32>
    %c0 = arith.constant 0 : index
    %c0_0 = arith.constant 0 : index
    %1 = vector.load %arg0[%c0, %c0_0] : memref<24x1xi32, #tpu.memory_space<vmem>>, vector<24x1xi32>
    %2 = vector.broadcast %1 : vector<24x1xi32> to vector<24x32xi32>
    %3 = arith.cmpi eq, %0, %2 : vector<24x32xi32>
    %4 = arith.extui %3 : vector<24x32xi1> to vector<24x32xi32>
    %5 = arith.sitofp %4 : vector<24x32xi32> to vector<24x32xf32>
    %c0_1 = arith.constant 0 : index
    %c0_2 = arith.constant 0 : index
    %6 = vector.load %arg1[%c0_1, %c0_2] : memref<24x1xi32, #tpu.memory_space<vmem>>, vector<24x1xi32>
    %7 = vector.broadcast %6 : vector<24x1xi32> to vector<24x32xi32>
    %8 = arith.cmpi eq, %0, %7 : vector<24x32xi32>
    %9 = arith.extui %8 : vector<24x32xi1> to vector<24x32xi32>
    %10 = arith.sitofp %9 : vector<24x32xi32> to vector<24x32xf32>
    %11 = arith.addf %5, %10 : vector<24x32xf32>
    %c0_3 = arith.constant 0 : index
    %c0_4 = arith.constant 0 : index
    %12 = vector.load %arg2[%c0_3, %c0_4] : memref<24x1xi32, #tpu.memory_space<vmem>>, vector<24x1xi32>
    %13 = vector.broadcast %12 : vector<24x1xi32> to vector<24x32xi32>
    %14 = arith.cmpi eq, %0, %13 : vector<24x32xi32>
    %15 = arith.extui %14 : vector<24x32xi1> to vector<24x32xi32>
    %16 = arith.sitofp %15 : vector<24x32xi32> to vector<24x32xf32>
    %17 = arith.addf %11, %16 : vector<24x32xf32>
    %c0_5 = arith.constant 0 : index
    %c0_6 = arith.constant 0 : index
    %18 = vector.load %arg3[%c0_5, %c0_6] : memref<24x32xf32, #tpu.memory_space<vmem>>, vector<24x32xf32>
    %19 = arith.addf %17, %18 : vector<24x32xf32>
    %c0_7 = arith.constant 0 : index
    %c0_8 = arith.constant 0 : index
    %20 = vector.load %arg4[%c0_7, %c0_8] : memref<32x256xf32, #tpu.memory_space<vmem>>, vector<32x256xf32>
    %cst = arith.constant dense<0.000000e+00> : vector<24x256xf32>
    %21 = tpu.matmul %19, %20, %cst {dimension_numbers = #tpu.dot_dimension_numbers<[1], [0], [0], [1], [0, 0, 1, 1], [], []>} : vector<24x32xf32>, vector<32x256xf32>, vector<24x256xf32> -> vector<24x256xf32>
    %c0_9 = arith.constant 0 : index
    %c0_10 = arith.constant 0 : index
    %22 = vector.load %arg5[%c0_9, %c0_10] : memref<1x256xf32, #tpu.memory_space<vmem>>, vector<1x256xf32>
    %23 = vector.broadcast %22 : vector<1x256xf32> to vector<24x256xf32>
    %24 = arith.addf %21, %23 : vector<24x256xf32>
    %25 = vector.extract_strided_slice %24 {offsets = [0, 0], sizes = [24, 128], strides = [1, 1]} : vector<24x256xf32> to vector<24x128xf32>
    %26 = vector.extract_strided_slice %24 {offsets = [0, 128], sizes = [24, 128], strides = [1, 1]} : vector<24x256xf32> to vector<24x128xf32>
    %cst_11 = arith.constant 0.000000e+00 : f32
    %27 = vector.broadcast %cst_11 : f32 to vector<24x128xf32>
    %28 = arith.maximumf %26, %27 : vector<24x128xf32>
    %29 = arith.addf %25, %28 : vector<24x128xf32>
    %c0_12 = arith.constant 0 : index
    %c0_13 = arith.constant 0 : index
    %c0_14 = arith.constant 0 : index
    %30 = vector.load %arg9[%c0_12, %c0_13, %c0_14] : memref<2x24x128xf32, #tpu.memory_space<vmem>>, vector<1x24x128xf32>
    %31 = vector.shape_cast %30 : vector<1x24x128xf32> to vector<24x128xf32>
    %32 = vector.extract_strided_slice %29 {offsets = [0, 0], sizes = [24, 32], strides = [1, 1]} : vector<24x128xf32> to vector<24x32xf32>
    %c0_15 = arith.constant 0 : index
    %c0_16 = arith.constant 0 : index
    %c0_17 = arith.constant 0 : index
    %33 = vector.load %arg6[%c0_15, %c0_16, %c0_17] : memref<2x32x512xf32, #tpu.memory_space<vmem>>, vector<1x32x512xf32>
    %34 = vector.shape_cast %33 : vector<1x32x512xf32> to vector<32x512xf32>
    %cst_18 = arith.constant dense<0.000000e+00> : vector<24x512xf32>
    %35 = tpu.matmul %32, %34, %cst_18 {dimension_numbers = #tpu.dot_dimension_numbers<[1], [0], [0], [1], [0, 0, 1, 1], [], []>} : vector<24x32xf32>, vector<32x512xf32>, vector<24x512xf32> -> vector<24x512xf32>
    %36 = vector.extract_strided_slice %31 {offsets = [0, 0], sizes = [24, 32], strides = [1, 1]} : vector<24x128xf32> to vector<24x32xf32>
    %c0_19 = arith.constant 0 : index
    %c0_20 = arith.constant 0 : index
    %c0_21 = arith.constant 0 : index
    %37 = vector.load %arg7[%c0_19, %c0_20, %c0_21] : memref<2x32x512xf32, #tpu.memory_space<vmem>>, vector<1x32x512xf32>
    %38 = vector.shape_cast %37 : vector<1x32x512xf32> to vector<32x512xf32>
    %cst_22 = arith.constant dense<0.000000e+00> : vector<24x512xf32>
    %39 = tpu.matmul %36, %38, %cst_22 {dimension_numbers = #tpu.dot_dimension_numbers<[1], [0], [0], [1], [0, 0, 1, 1], [], []>} : vector<24x32xf32>, vector<32x512xf32>, vector<24x512xf32> -> vector<24x512xf32>
    %40 = arith.addf %35, %39 : vector<24x512xf32>
    %c0_23 = arith.constant 0 : index
    %c0_24 = arith.constant 0 : index
    %c0_25 = arith.constant 0 : index
    %41 = vector.load %arg8[%c0_23, %c0_24, %c0_25] : memref<2x1x512xf32, #tpu.memory_space<vmem>>, vector<1x1x512xf32>
    %42 = vector.shape_cast %41 : vector<1x1x512xf32> to vector<1x512xf32>
    %43 = vector.broadcast %42 : vector<1x512xf32> to vector<24x512xf32>
    %44 = arith.addf %40, %43 : vector<24x512xf32>
    %45 = vector.extract_strided_slice %44 {offsets = [0, 0], sizes = [24, 128], strides = [1, 1]} : vector<24x512xf32> to vector<24x128xf32>
    %46 = arith.negf %45 : vector<24x128xf32>
    %47 = math.exp %46 : vector<24x128xf32>
    %cst_26 = arith.constant 1.000000e+00 : f32
    %48 = vector.broadcast %cst_26 : f32 to vector<24x128xf32>
    %49 = arith.addf %48, %47 : vector<24x128xf32>
    %50 = arith.divf %48, %49 : vector<24x128xf32>
    %51 = vector.extract_strided_slice %44 {offsets = [0, 128], sizes = [24, 128], strides = [1, 1]} : vector<24x512xf32> to vector<24x128xf32>
    %52 = arith.negf %51 : vector<24x128xf32>
    %53 = math.exp %52 : vector<24x128xf32>
    %cst_27 = arith.constant 1.000000e+00 : f32
    %54 = vector.broadcast %cst_27 : f32 to vector<24x128xf32>
    %55 = arith.addf %54, %53 : vector<24x128xf32>
    %56 = arith.divf %54, %55 : vector<24x128xf32>
    %57 = vector.extract_strided_slice %44 {offsets = [0, 256], sizes = [24, 128], strides = [1, 1]} : vector<24x512xf32> to vector<24x128xf32>
    %58 = vector.extract_strided_slice %44 {offsets = [0, 384], sizes = [24, 128], strides = [1, 1]} : vector<24x512xf32> to vector<24x128xf32>
    %59 = arith.mulf %50, %58 : vector<24x128xf32>
    %60 = arith.addf %57, %59 : vector<24x128xf32>
    %61 = math.tanh %60 : vector<24x128xf32>
    %cst_28 = arith.constant 1.000000e+00 : f32
    %62 = vector.broadcast %cst_28 : f32 to vector<24x128xf32>
    %63 = arith.subf %62, %56 : vector<24x128xf32>
    %64 = arith.mulf %63, %61 : vector<24x128xf32>
    %65 = arith.mulf %56, %31 : vector<24x128xf32>
    %66 = arith.addf %64, %65 : vector<24x128xf32>
    %c0_29 = arith.constant 0 : index
    %c0_30 = arith.constant 0 : index
    %c0_31 = arith.constant 0 : index
    %67 = vector.load %arg14[%c0_29, %c0_30, %c0_31] : memref<2x24x128xf32, #tpu.memory_space<vmem>>, vector<1x24x128xf32>
    %68 = vector.shape_cast %67 : vector<1x24x128xf32> to vector<24x128xf32>
    %69 = vector.shape_cast %66 : vector<24x128xf32> to vector<1x24x128xf32>
    tpu.vector_store %arg14[%c0_29, %c0_30, %c0_31], %69 {strides = array<i32>} : memref<2x24x128xf32, #tpu.memory_space<vmem>>, vector<1x24x128xf32>,
    %c1 = arith.constant 1 : index
    %c0_32 = arith.constant 0 : index
    %c0_33 = arith.constant 0 : index
    %70 = vector.load %arg9[%c1, %c0_32, %c0_33] : memref<2x24x128xf32, #tpu.memory_space<vmem>>, vector<1x24x128xf32>
    %71 = vector.shape_cast %70 : vector<1x24x128xf32> to vector<24x128xf32>
    %72 = vector.extract_strided_slice %66 {offsets = [0, 0], sizes = [24, 32], strides = [1, 1]} : vector<24x128xf32> to vector<24x32xf32>
    %c1_34 = arith.constant 1 : index
    %c0_35 = arith.constant 0 : index
    %c0_36 = arith.constant 0 : index
    %73 = vector.load %arg6[%c1_34, %c0_35, %c0_36] : memref<2x32x512xf32, #tpu.memory_space<vmem>>, vector<1x32x512xf32>
    %74 = vector.shape_cast %73 : vector<1x32x512xf32> to vector<32x512xf32>
    %cst_37 = arith.constant dense<0.000000e+00> : vector<24x512xf32>
    %75 = tpu.matmul %72, %74, %cst_37 {dimension_numbers = #tpu.dot_dimension_numbers<[1], [0], [0], [1], [0, 0, 1, 1], [], []>} : vector<24x32xf32>, vector<32x512xf32>, vector<24x512xf32> -> vector<24x512xf32>
    %76 = vector.extract_strided_slice %71 {offsets = [0, 0], sizes = [24, 32], strides = [1, 1]} : vector<24x128xf32> to vector<24x32xf32>
    %c1_38 = arith.constant 1 : index
    %c0_39 = arith.constant 0 : index
    %c0_40 = arith.constant 0 : index
    %77 = vector.load %arg7[%c1_38, %c0_39, %c0_40] : memref<2x32x512xf32, #tpu.memory_space<vmem>>, vector<1x32x512xf32>
    %78 = vector.shape_cast %77 : vector<1x32x512xf32> to vector<32x512xf32>
    %cst_41 = arith.constant dense<0.000000e+00> : vector<24x512xf32>
    %79 = tpu.matmul %76, %78, %cst_41 {dimension_numbers = #tpu.dot_dimension_numbers<[1], [0], [0], [1], [0, 0, 1, 1], [], []>} : vector<24x32xf32>, vector<32x512xf32>, vector<24x512xf32> -> vector<24x512xf32>
    %80 = arith.addf %75, %79 : vector<24x512xf32>
    %c1_42 = arith.constant 1 : index
    %c0_43 = arith.constant 0 : index
    %c0_44 = arith.constant 0 : index
    %81 = vector.load %arg8[%c1_42, %c0_43, %c0_44] : memref<2x1x512xf32, #tpu.memory_space<vmem>>, vector<1x1x512xf32>
    %82 = vector.shape_cast %81 : vector<1x1x512xf32> to vector<1x512xf32>
    %83 = vector.broadcast %82 : vector<1x512xf32> to vector<24x512xf32>
    %84 = arith.addf %80, %83 : vector<24x512xf32>
    %85 = vector.extract_strided_slice %84 {offsets = [0, 0], sizes = [24, 128], strides = [1, 1]} : vector<24x512xf32> to vector<24x128xf32>
    %86 = arith.negf %85 : vector<24x128xf32>
    %87 = math.exp %86 : vector<24x128xf32>
    %cst_45 = arith.constant 1.000000e+00 : f32
    %88 = vector.broadcast %cst_45 : f32 to vector<24x128xf32>
    %89 = arith.addf %88, %87 : vector<24x128xf32>
    %90 = arith.divf %88, %89 : vector<24x128xf32>
    %91 = vector.extract_strided_slice %84 {offsets = [0, 128], sizes = [24, 128], strides = [1, 1]} : vector<24x512xf32> to vector<24x128xf32>
    %92 = arith.negf %91 : vector<24x128xf32>
    %93 = math.exp %92 : vector<24x128xf32>
    %cst_46 = arith.constant 1.000000e+00 : f32
    %94 = vector.broadcast %cst_46 : f32 to vector<24x128xf32>
    %95 = arith.addf %94, %93 : vector<24x128xf32>
    %96 = arith.divf %94, %95 : vector<24x128xf32>
    %97 = vector.extract_strided_slice %84 {offsets = [0, 256], sizes = [24, 128], strides = [1, 1]} : vector<24x512xf32> to vector<24x128xf32>
    %98 = vector.extract_strided_slice %84 {offsets = [0, 384], sizes = [24, 128], strides = [1, 1]} : vector<24x512xf32> to vector<24x128xf32>
    %99 = arith.mulf %90, %98 : vector<24x128xf32>
    %100 = arith.addf %97, %99 : vector<24x128xf32>
    %101 = math.tanh %100 : vector<24x128xf32>
    %cst_47 = arith.constant 1.000000e+00 : f32
    %102 = vector.broadcast %cst_47 : f32 to vector<24x128xf32>
    %103 = arith.subf %102, %96 : vector<24x128xf32>
    %104 = arith.mulf %103, %101 : vector<24x128xf32>
    %105 = arith.mulf %96, %71 : vector<24x128xf32>
    %106 = arith.addf %104, %105 : vector<24x128xf32>
    %c1_48 = arith.constant 1 : index
    %c0_49 = arith.constant 0 : index
    %c0_50 = arith.constant 0 : index
    %107 = vector.load %arg14[%c1_48, %c0_49, %c0_50] : memref<2x24x128xf32, #tpu.memory_space<vmem>>, vector<1x24x128xf32>
    %108 = vector.shape_cast %107 : vector<1x24x128xf32> to vector<24x128xf32>
    %109 = vector.shape_cast %106 : vector<24x128xf32> to vector<1x24x128xf32>
    tpu.vector_store %arg14[%c1_48, %c0_49, %c0_50], %109 {strides = array<i32>} : memref<2x24x128xf32, #tpu.memory_space<vmem>>, vector<1x24x128xf32>,
    %110 = vector.extract_strided_slice %106 {offsets = [0, 0], sizes = [24, 32], strides = [1, 1]} : vector<24x128xf32> to vector<24x32xf32>
    %c0_51 = arith.constant 0 : index
    %c0_52 = arith.constant 0 : index
    %111 = vector.load %arg10[%c0_51, %c0_52] : memref<32x128xf32, #tpu.memory_space<vmem>>, vector<32x128xf32>
    %cst_53 = arith.constant dense<0.000000e+00> : vector<24x128xf32>
    %112 = tpu.matmul %110, %111, %cst_53 {dimension_numbers = #tpu.dot_dimension_numbers<[1], [0], [0], [1], [0, 0, 1, 1], [], []>} : vector<24x32xf32>, vector<32x128xf32>, vector<24x128xf32> -> vector<24x128xf32>
    %c0_54 = arith.constant 0 : index
    %c0_55 = arith.constant 0 : index
    %113 = vector.load %arg11[%c0_54, %c0_55] : memref<1x128xf32, #tpu.memory_space<vmem>>, vector<1x128xf32>
    %114 = vector.broadcast %113 : vector<1x128xf32> to vector<24x128xf32>
    %115 = arith.addf %112, %114 : vector<24x128xf32>
    %cst_56 = arith.constant 0.000000e+00 : f32
    %116 = vector.broadcast %cst_56 : f32 to vector<24x128xf32>
    %117 = arith.maximumf %115, %116 : vector<24x128xf32>
    %118 = vector.extract_strided_slice %117 {offsets = [0, 0], sizes = [24, 32], strides = [1, 1]} : vector<24x128xf32> to vector<24x32xf32>
    %c0_57 = arith.constant 0 : index
    %c0_58 = arith.constant 0 : index
    %119 = vector.load %arg12[%c0_57, %c0_58] : memref<32x128xf32, #tpu.memory_space<vmem>>, vector<32x128xf32>
    %cst_59 = arith.constant dense<0.000000e+00> : vector<24x128xf32>
    %120 = tpu.matmul %118, %119, %cst_59 {dimension_numbers = #tpu.dot_dimension_numbers<[1], [0], [0], [1], [0, 0, 1, 1], [], []>} : vector<24x32xf32>, vector<32x128xf32>, vector<24x128xf32> -> vector<24x128xf32>
    %c0_60 = arith.constant 0 : index
    %c0_61 = arith.constant 0 : index
    %121 = vector.load %arg13[%c0_60, %c0_61] : memref<1x128xf32, #tpu.memory_space<vmem>>, vector<1x128xf32>
    %122 = vector.broadcast %121 : vector<1x128xf32> to vector<24x128xf32>
    %123 = arith.addf %120, %122 : vector<24x128xf32>
    %c0_62 = arith.constant 0 : index
    %c0_63 = arith.constant 0 : index
    %124 = vector.load %arg15[%c0_62, %c0_63] : memref<24x128xf32, #tpu.memory_space<vmem>>, vector<24x128xf32>
    tpu.vector_store %arg15[%c0_62, %c0_63], %123 {strides = array<i32>} : memref<24x128xf32, #tpu.memory_space<vmem>>, vector<24x128xf32>,
    return
  }
}

</mosaic_0001>

<bundles_post_ra>
// kernel: switch_cnet_forward.1
= control target key start
LH: loop header
LB: loop body
LE: loop exit
PB: predicated region body
PF: predicated region fallthrough
CT: control target
= control target key end

     0   :  { %21 = vsyncpa [#allocation3], 0  ;;  %s2079_s0 = inlined_call_operand.vmem [shape: s32[24,1], index: 0, kind: input, shape index: {}]   ;;  %s2080_s1 = inlined_call_operand.vmem [shape: s32[24,1], index: 1, kind: input, shape index: {}]   ;;  %s2081_s2 = inlined_call_operand.vmem [shape: s32[24,1], index: 2, kind: input, shape index: {}]   ;;  %s2082_s3 = inlined_call_operand.vmem [shape: f32[24,32], index: 3, kind: input, shape index: {}]   ;;  %s2083_s4 = inlined_call_operand.vmem [shape: f32[32,256], index: 4, kind: input, shape index: {}]   ;;  %s2084_s5 = inlined_call_operand.vmem [shape: f32[1,256], index: 5, kind: input, shape index: {}]   ;;  %s2085_s6 = inlined_call_operand.hbm [shape: f32[2,32,512], index: 6, kind: input, shape index: {}]   ;;  %s2086_s7 = inlined_call_operand.hbm [shape: f32[2,32,512], index: 7, kind: input, shape index: {}]   ;;  %s2087_s8 = inlined_call_operand.vmem [shape: f32[2,1,512], index: 8, kind: input, shape index: {}]   ;;  %s2088_s9 = inlined_call_operand.hbm [shape: f32[2,24,128], index: 9, kind: input, shape index: {}, may-alias: {9,14}]   ;;  %s2089_s10 = inlined_call_operand.vmem [shape: f32[32,128], index: 10, kind: input, shape index: {}]   ;;  %s2090_s11 = inlined_call_operand.vmem [shape: f32[1,128], index: 11, kind: input, shape index: {}]   ;;  %s2091_s12 = inlined_call_operand.vmem [shape: f32[32,128], index: 12, kind: input, shape index: {}]   ;;  %s2092_s13 = inlined_call_operand.vmem [shape: f32[1,128], index: 13, kind: input, shape index: {}]   ;;  %s2093_s14 = inlined_call_operand.hbm [shape: f32[2,24,128], index: 14, kind: output, shape index: {0}, may-alias: {9,14}]   ;;  %s2094_s15 = inlined_call_operand.hbm [shape: f32[24,128], index: 15, kind: output, shape index: {1}]  }
   0x1   :  { %22 = vsyncpa [#allocation6], 0 }
   0x2   :  { %23 = vsyncpa [#allocation4], 0 }
   0x3   :  { %24 = vsyncpa [#allocation10], 0  ;;  %s54_s20 = sshll.u32 %s2086_s7, 4  ;;  %s1520_s21 = smov [#allocation5]   ;;  %s55_s20 = int_to_ptr.hbm [resolvable:$true] %s54_s20 }
   0x4   :  { %s56_s22 = sshll.u32 %s1520_s21, 4  ;;  %s41_s25 = sshll.u32 %s2085_s6, 4  ;;  %s57_s22 = int_to_ptr.vmem [resolvable:$true] %s56_s22  ;;  %s42_s25 = int_to_ptr.hbm [resolvable:$true] %s41_s25 }
   0x5   :  { %s1521_s26 = smov 512   ;;  %s1522_s27 = smov 32  }
   0x6   :  { %62 = dma.hbm_to_vmem [thread:$0]  %s55_s20, 4096, %s57_s22, [#allocation6], %s1521_s26, %s1521_s26, %s1522_s27  }
   0x7   :  { %s1523_s28 = smov [#allocation2]   ;;  %s69_s17 = sshll.u32 %s2088_s9, 4  ;;  %s70_s17 = int_to_ptr.hbm [resolvable:$true] %s69_s17 }
   0x8   :  { %s43_s29 = sshll.u32 %s1523_s28, 4  ;;  %s1524_s7 = smov [#allocation7]   ;;  %s44_s29 = int_to_ptr.vmem [resolvable:$true] %s43_s29 }
   0x9   :  { %49 = dma.hbm_to_vmem [thread:$0]  %s42_s25, 4096, %s44_s29, [#allocation3], %s1521_s26, %s1521_s26, %s1522_s27  }
   0xa   :  { %s71_s18 = sshll.u32 %s1524_s7, 4  ;;  %s1525_s19 = smov 128   ;;  %s72_s18 = int_to_ptr.vmem [resolvable:$true] %s71_s18 }
   0xb   :  { %s1526_s21 = smov 8  }
   0xc   :  { %77 = dma.hbm_to_vmem [thread:$0]  %s70_s17, 768, %s72_s18, [#allocation6], %s1525_s19, %s1525_s19, %s1526_s21  }
   0xd   :  { %1512 = dma.done.wait [#allocation3], 4096  }
   0xe   :  { %1513 = vsyncadd [#allocation3], 4294963200 }
   0xf   :  { %1514 = dma.done.wait [#allocation6], 4864  }
  0x10   :  { %1515 = vsyncadd [#allocation6], 4294962432  ;;  %v1527_v0 = vmov 0   ;;  %v145_v1 = vld [vmem:[%s2081_s2] sm:$0xff]  ;;  %v122_v3 = vld [vmem:[%s2080_s1 + $0x8] sm:$0xff]  ;;  %v98_v18 = vlaneseq  ;;  %vm189_vm5 = vcmask 261120  }
  0x11   :  { %1328 = vset.pattern.permute.xlu1 %v1527_v0  ;;  %1327 = vset.pattern.permute.xlu0 %v1527_v0  ;;  %v100_v2 = vld [vmem:[%s2079_s0] sm:$0xff]  ;;  %v101_v4 = vld [vmem:[%s2079_s0 + $0x8] sm:$0xff]  ;;  %v123_v7 = vld [vmem:[%s2080_s1 + $0x10] sm:$0xff]  ;;  %v1528_v43 = vmov 0.0   ;;  %s1202_s23 = sshll.u32 %s2093_s14, 4  ;;  %s1530_s25 = smov [#allocation9]   ;;  %s1203_s23 = int_to_ptr.hbm [resolvable:$true] %s1202_s23 }
  0x12   :  { %1329 = vset.pattern.permute.xlu2 %v1527_v0  ;;  %149 = vperm.xlu1 %1328, %v145_v1   ;;  %v121_v5 = vld [vmem:[%s2080_s1] sm:$0xff]  ;;  %v146_v6 = vld [vmem:[%s2081_s2 + $0x8] sm:$0xff]  ;;  %v102_v8 = vld [vmem:[%s2079_s0 + $0x10] sm:$0xff]  ;;  %v1674_v28 = vand.u32 127, %v98_v18  ;;  %s1213_s14 = sshll.u32 %s1530_s25, 4  ;;  %s1215_s26 = sshll.u32 %s2094_s15, 4  ;;  %s1214_s14 = int_to_ptr.vmem [resolvable:$true] %s1213_s14  ;;  %s1216_s26 = int_to_ptr.hbm [resolvable:$true] %s1215_s26 }
  0x13   :  { %104 = vperm.xlu0 %1327, %v100_v2   ;;  %128 = vperm.xlu2 %1329, %v122_v3   ;;  %v147_v9 = vld [vmem:[%s2081_s2 + $0x10] sm:$0xff]  ;;  %v182_v11 = vld [vmem:[%s2083_s4 + $0x38] sm:$0xff]  ;;  %v179_v12 = vld [vmem:[%s2083_s4 + $0x20] sm:$0xff] }
  0x14   :  { %v181_v10 = vld [vmem:[%s2083_s4 + $0x30] sm:$0xff]  ;;  %237 = vmatpush.msra.mxu1 %v182_v11  ;;  %v180_v13 = vld [vmem:[%s2083_s4 + $0x28] sm:$0xff]  ;;  %v178_v15 = vld [vmem:[%s2083_s4 + $0x18] sm:$0xff] }
  0x15   :  { %211 = vmatpush.msra.mxu0 %v181_v10  ;;  %v177_v14 = vld [vmem:[%s2083_s4 + $0x10] sm:$0xff]  ;;  %v175_v16 = vld [vmem:[%s2083_s4] sm:$0xff]  ;;  %v176_v17 = vld [vmem:[%s2083_s4 + $0x8] sm:$0xff] }
  0x16   :  { %238 = vmatpush.msra.mxu1 %v180_v13  ;;  %v288_v22 = vld [vmem:[#allocation5 + $0x60] sm:$0xff]  ;;  %v289_v23 = vld [vmem:[#allocation5 + $0x68] sm:$0xff]  ;;  %v290_v24 = vld [vmem:[#allocation5 + $0x70] sm:$0xff] }
  0x17   :  { %212 = vmatpush.msra.mxu0 %v179_v12  ;;  %313 = vmatpush.msra.mxu2 %v288_v22  ;;  %v291_v25 = vld [vmem:[#allocation5 + $0x78] sm:$0xff]  ;;  %v284_v26 = vld [vmem:[#allocation5 + $0x40] sm:$0xff]  ;;  %v285_v27 = vld [vmem:[#allocation5 + $0x48] sm:$0xff] }
  0x18   :  { %239 = vmatpush.msra.mxu1 %v178_v15  ;;  %339 = vmatpush.msra.mxu3 %v289_v23  ;;  %v286_v29 = vld [vmem:[#allocation5 + $0x50] sm:$0xff]  ;;  %v287_v30 = vld [vmem:[#allocation5 + $0x58] sm:$0xff]  ;;  %v280_v31 = vld [vmem:[#allocation5 + $0x20] sm:$0xff] }
  0x19   :  { %213 = vmatpush.msra.mxu0 %v177_v14  ;;  %314 = vmatpush.msra.mxu2 %v284_v26  ;;  %v281_v32 = vld [vmem:[#allocation5 + $0x28] sm:$0xff]  ;;  %v282_v33 = vld [vmem:[#allocation5 + $0x30] sm:$0xff]  ;;  %v283_v34 = vld [vmem:[#allocation5 + $0x38] sm:$0xff] }
  0x1a   :  { %107 = vperm.xlu1 %1328, %v101_v4   ;;  %240 = vmatpush.msra.mxu1 %v176_v17  ;;  %v276_v35 = vld [vmem:[#allocation5] sm:$0xff]  ;;  %v277_v36 = vld [vmem:[#allocation5 + $0x8] sm:$0xff]  ;;  %v278_v37 = vld [vmem:[#allocation5 + $0x10] sm:$0xff] }
  0x1b   :  { %125 = vperm.xlu0 %1327, %v121_v5   ;;  %152 = vperm.xlu2 %1329, %v146_v6   ;;  %v279_v38 = vld [vmem:[#allocation5 + $0x18] sm:$0xff]  ;;  %v1677_v39 = vld [vmem:[#allocation7] sm:$0xff]  ;;  %v1699_v56 = vld [vmem:[#allocation7 + $0x8] sm:$0xff] }
  0x1c   :  { %214 = vmatpush.msra.mxu0 %v175_v16  ;;  %391 = vmatpush.msrb.mxu1 %v291_v25  ;;  %v272_v42 = vld [vmem:[#allocation2 + $0x60] sm:$0xff]  ;;  %v273_v60 = vld [vmem:[#allocation2 + $0x68] sm:$0xff]  ;;  %v1713_v6 = vld [vmem:[#allocation7 + $0x10] sm:$0xff] }
  0x1d   :  { %340 = vmatpush.msra.mxu3 %v285_v27  ;;  %315 = vmatpush.msra.mxu2 %v280_v31  ;;  %v268_v47 = vld [vmem:[#allocation2 + $0x40] sm:$0xff]  ;;  %v269_v62 = vld [vmem:[#allocation2 + $0x48] sm:$0xff]  ;;  %v274_v11 = vld [vmem:[#allocation2 + $0x70] sm:$0xff] }
  0x1e   :  { %365 = vmatpush.msrb.mxu0 %v290_v24  ;;  %392 = vmatpush.msrb.mxu1 %v287_v30  ;;  %v169_v52 = vld [vmem:[%s2082_s3] sm:$0xff]  ;;  %v170_v3 = vld [vmem:[%s2082_s3 + $0x8] sm:$0xff]  ;;  %v275_v12 = vld [vmem:[#allocation2 + $0x78] sm:$0xff] }
  0x1f   :  { %341 = vmatpush.msra.mxu3 %v281_v32  ;;  %316 = vmatpush.msra.mxu2 %v276_v35  ;;  %v264_v61 = vld [vmem:[#allocation2 + $0x20] sm:$0xff]  ;;  %v270_v13 = vld [vmem:[#allocation2 + $0x50] sm:$0xff]  ;;  %v271_v14 = vld [vmem:[#allocation2 + $0x58] sm:$0xff] }
  0x20   :  { %366 = vmatpush.msrb.mxu0 %v286_v29  ;;  %393 = vmatpush.msrb.mxu1 %v283_v34  ;;  %v265_v15 = vld [vmem:[#allocation2 + $0x28] sm:$0xff]  ;;  %v266_v16 = vld [vmem:[#allocation2 + $0x30] sm:$0xff]  ;;  %v267_v17 = vld [vmem:[#allocation2 + $0x38] sm:$0xff] }
  0x21   :  { %342 = vmatpush.msra.mxu3 %v277_v36  ;;  %1249 = vmatmul.msk.f32.vlgmr.msra.gmra.mxu2 %vm189_vm5, %v1677_v39  ;;  %v260_v18 = vld [vmem:[#allocation2] sm:$0xff] }
  0x22   :  { %131 = vperm.xlu1 %1328, %v123_v7   ;;  %367 = vmatpush.msrb.mxu0 %v282_v33  ;;  %v183_v22 = vld [vmem:[%s2084_s5] sm:$0x3] }
  0x23   :  { %110 = vperm.xlu0 %1327, %v102_v8   ;;  %155 = vperm.xlu2 %1329, %v147_v9   ;;  %v171_v9 = vld [vmem:[%s2082_s3 + $0x10] sm:$0xff]  ;;  %v186_v23 = vperm.slane %v183_v22, 1  ;;  %v185_v24 = vperm.slane %v183_v22, 0 }
  0x24   :  { %368 = vmatpush.msrb.mxu0 %v278_v37  ;;  %394 = vmatpush.msrb.mxu1 %v279_v38 }
  0x25   :  { %1252 = vmatmul.msk.f32.vlgmr.msra.gmra.mxu3 %vm189_vm5, %v1677_v39  ;;  %426 = vmatpush.msrb.mxu2 %v272_v42 }
  0x26   :  { %452 = vmatpush.msrb.mxu3 %v273_v60  ;;  %v711_v60 = vld [vmem:[#allocation5 + $0xd8] sm:$0xff] }
  0x27   :  { %427 = vmatpush.msrb.mxu2 %v268_v47 }
  0x28   :  { %453 = vmatpush.msrb.mxu3 %v269_v62  ;;  %v705_v62 = vld [vmem:[#allocation5 + $0xa8] sm:$0xff] }
  0x29   :  { %1250 = vmatmul.msk.f32.gmra.mxu2 %vm189_vm5, %v1699_v56 }
  0x2a   :  { %428 = vmatpush.msrb.mxu2 %v264_v61  ;;  %454 = vmatpush.msrb.mxu3 %v265_v15  ;;  %v704_v61 = vld [vmem:[#allocation5 + $0xa0] sm:$0xff] }
  0x2c   :  { %429 = vmatpush.msrb.mxu2 %v260_v18 }
  0x2d   :  { %1253 = vmatmul.msk.f32.gmra.mxu3 %vm189_vm5, %v1699_v56 }
  0x31   :  { %1251 = vmatmul.msk.f32.gmra.mxu2 %vm189_vm5, %v1713_v6 }
  0x35   :  { %1254 = vmatmul.msk.f32.gmra.mxu3 %vm189_vm5, %v1713_v6 }
  0x6d   :  { %v129_v19 = vpop.permute.xlu2 %128 }
  0x6e   :  { %vm134_vm1 = vcmp.eq.s32.totalorder %v1674_v28, %v129_v19  ;;  %v261_v19 = vld [vmem:[#allocation2 + $0x8] sm:$0xff] }
  0x6f   :  { %v1238_v49 = vsel %vm134_vm1, 1.0, %v1528_v43  ;;  %455 = vmatpush.msrb.mxu3 %v261_v19  ;;  %v1794_v19 = vld [vmem:[#allocation7 + $0x20] sm:$0xff] }
  0x75   :  { %v153_v45 = vpop.permute.xlu2 %152 }
  0x76   :  { %vm158_vm6 = vcmp.eq.s32.totalorder %v1674_v28, %v153_v45 }
  0x77   :  { %v1241_v57 = vsel %vm158_vm6, 1.0, %v1528_v43 }
  0x7d   :  { %v156_v0 = vpop.permute.xlu2 %155 }
  0x7e   :  { %vm159_vm9 = vcmp.eq.s32.totalorder %v1674_v28, %v156_v0 }
  0x7f   :  { %v1242_v7 = vsel %vm159_vm9, 1.0, %v1528_v43 }
  0x84   :  { %v150_v20 = vpop.permute.xlu1 %149 }
  0x85   :  { %v105_v21 = vpop.permute.xlu0 %104  ;;  %vm157_vm2 = vcmp.eq.s32.totalorder %v1674_v28, %v150_v20  ;;  %v262_v20 = vld [vmem:[#allocation2 + $0x10] sm:$0xff] }
  0x86   :  { %vm112_vm0 = vcmp.eq.s32.totalorder %v1674_v28, %v105_v21  ;;  %v1240_v50 = vsel %vm157_vm2, 1.0, %v1528_v43  ;;  %v263_v21 = vld [vmem:[#allocation2 + $0x18] sm:$0xff] }
  0x87   :  { %v1234_v44 = vsel %vm112_vm0, 1.0, %v1528_v43 }
  0x8c   :  { %v108_v40 = vpop.permute.xlu1 %107 }
  0x8d   :  { %v126_v41 = vpop.permute.xlu0 %125  ;;  %vm113_vm3 = vcmp.eq.s32.totalorder %v1674_v28, %v108_v40 }
  0x8e   :  { %vm133_vm4 = vcmp.eq.s32.totalorder %v1674_v28, %v126_v41  ;;  %v1235_v51 = vsel %vm113_vm3, 1.0, %v1528_v43 }
  0x8f   :  { %v1237_v46 = vsel %vm133_vm4, 1.0, %v1528_v43  ;;  %v143_v54 = vadd.f32 %v1238_v49, %v1235_v51  ;;  %v712_v49 = vld [vmem:[#allocation5 + $0xe0] sm:$0xff] }
  0x90   :  { %v142_v48 = vadd.f32 %v1237_v46, %v1234_v44  ;;  %737 = vmatpush.msra.mxu2 %v712_v49  ;;  %v708_v51 = vld [vmem:[#allocation5 + $0xc0] sm:$0xff]  ;;  %v688_v49 = vld [vmem:[#allocation2 + $0xa8] sm:$0xff] }
  0x91   :  { %v167_v63 = vadd.f32 %v1241_v57, %v143_v54  ;;  %v715_v54 = vld [vmem:[#allocation5 + $0xf8] sm:$0xff] }
  0x92   :  { %v166_v53 = vadd.f32 %v1240_v50, %v142_v48  ;;  %738 = vmatpush.msra.mxu2 %v708_v51 }
  0x93   :  { %v173_v5 = vadd.f32 %v170_v3, %v167_v63  ;;  %v706_v63 = vld [vmem:[#allocation5 + $0xb0] sm:$0xff]  ;;  %v701_v3 = vld [vmem:[#allocation5 + $0x88] sm:$0xff] }
  0x94   :  { %v172_v55 = vadd.f32 %v169_v52, %v166_v53  ;;  %v132_v58 = vpop.permute.xlu1 %131  ;;  %v713_v52 = vld [vmem:[#allocation5 + $0xe8] sm:$0xff]  ;;  %v714_v53 = vld [vmem:[#allocation5 + $0xf0] sm:$0xff]  ;;  %739 = vmatpush.msra.mxu2 %v704_v61 }
  0x95   :  { %v111_v59 = vpop.permute.xlu0 %110  ;;  %vm135_vm7 = vcmp.eq.s32.totalorder %v1674_v28, %v132_v58  ;;  %763 = vmatpush.msra.mxu3 %v713_v52  ;;  %v709_v58 = vld [vmem:[#allocation5 + $0xc8] sm:$0xff] }
  0x96   :  { %vm114_vm8 = vcmp.eq.s32.totalorder %v1674_v28, %v111_v59  ;;  %1243 = vmatmul.msk.f32.vlgmr.msra.gmra.mxu0 %vm189_vm5, %v172_v55  ;;  %1246 = vmatmul.msk.f32.vlgmr.msra.gmra.mxu1 %vm189_vm5, %v172_v55  ;;  %v1239_v1 = vsel %vm135_vm7, 1.0, %v1528_v43  ;;  %v710_v59 = vld [vmem:[#allocation5 + $0xd0] sm:$0xff] }
  0x97   :  { %v1236_v2 = vsel %vm114_vm8, 1.0, %v1528_v43  ;;  %478 = vmatpush.msra.mxu0 %v274_v11  ;;  %504 = vmatpush.msra.mxu1 %v275_v12 }
  0x98   :  { %v144_v4 = vadd.f32 %v1239_v1, %v1236_v2  ;;  %764 = vmatpush.msra.mxu3 %v709_v58  ;;  %v707_v1 = vld [vmem:[#allocation5 + $0xb8] sm:$0xff]  ;;  %v700_v2 = vld [vmem:[#allocation5 + $0x80] sm:$0xff]  ;;  %v684_v58 = vld [vmem:[#allocation2 + $0x88] sm:$0xff] }
  0x99   :  { %479 = vmatpush.msra.mxu0 %v270_v13  ;;  %505 = vmatpush.msra.mxu1 %v271_v14 }
  0x9a   :  { %v168_v8 = vadd.f32 %v1242_v7, %v144_v4  ;;  %765 = vmatpush.msra.mxu3 %v705_v62  ;;  %v702_v4 = vld [vmem:[#allocation5 + $0x90] sm:$0xff]  ;;  %740 = vmatpush.msra.mxu2 %v700_v2  ;;  %v1767_v7 = vld [vmem:[#allocation7 + $0x18] sm:$0xff] }
  0x9b   :  { %480 = vmatpush.msra.mxu0 %v266_v16  ;;  %506 = vmatpush.msra.mxu1 %v267_v17  ;;  %v690_v62 = vld [vmem:[#allocation2 + $0xb8] sm:$0xff] }
  0x9c   :  { %v174_v10 = vadd.f32 %v171_v9, %v168_v8  ;;  %766 = vmatpush.msra.mxu3 %v701_v3  ;;  %v1778_v9 = vld [vmem:[%s2087_s8] sm:$0xf]  ;;  %v686_v3 = vld [vmem:[#allocation2 + $0x98] sm:$0xff] }
  0x9d   :  { %481 = vmatpush.msra.mxu0 %v262_v20  ;;  %507 = vmatpush.msra.mxu1 %v263_v21  ;;  %v1788_v11 = vperm.slane %v1778_v9, 1 }
  0x9e   :  { %1244 = vmatmul.msk.f32.gmra.mxu0 %vm189_vm5, %v173_v5  ;;  %1247 = vmatmul.msk.f32.gmra.mxu1 %vm189_vm5, %v173_v5  ;;  %v703_v5 = vld [vmem:[#allocation5 + $0x98] sm:$0xff] }
  0xa4   :  { %v318_v44 = vpop.f32.mrf.mxu2 }
  0xa6   :  { %1245 = vmatmul.msk.f32.gmra.mxu0 %vm189_vm5, %v174_v10  ;;  %1248 = vmatmul.msk.f32.gmra.mxu1 %vm189_vm5, %v174_v10  ;;  %v1785_v10 = vperm.slane %v1778_v9, 0 }
  0xa8   :  { %v344_v45 = vpop.f32.mrf.mxu3 }
  0xac   :  { %v1753_v46 = vpop.f32.mrf.mxu2 }
  0xae   :  { %1255 = vmatmul.msk.f32.vlgmr.msrb.gmra.mxu0 %vm189_vm5, %v1677_v39  ;;  %1258 = vmatmul.msk.f32.vlgmr.msrb.gmra.mxu1 %vm189_vm5, %v1677_v39 }
  0xaf   :  { %789 = vmatpush.msrb.mxu0 %v714_v53  ;;  %815 = vmatpush.msrb.mxu1 %v715_v54  ;;  %v683_v53 = vld [vmem:[#allocation2 + $0x80] sm:$0xff]  ;;  %v694_v54 = vld [vmem:[#allocation2 + $0xd8] sm:$0xff] }
  0xb0   :  { %v1755_v47 = vpop.f32.mrf.mxu3 }
  0xb1   :  { %790 = vmatpush.msrb.mxu0 %v710_v59  ;;  %816 = vmatpush.msrb.mxu1 %v711_v60  ;;  %v689_v60 = vld [vmem:[#allocation2 + $0xb0] sm:$0xff] }
  0xb3   :  { %791 = vmatpush.msrb.mxu0 %v706_v63  ;;  %817 = vmatpush.msrb.mxu1 %v707_v1 }
  0xb4   :  { %v1761_v55 = vpop.f32.mrf.mxu2 }
  0xb5   :  { %792 = vmatpush.msrb.mxu0 %v702_v4  ;;  %818 = vmatpush.msrb.mxu1 %v703_v5 }
  0xb6   :  { %1256 = vmatmul.msk.f32.gmra.mxu0 %vm189_vm5, %v1699_v56  ;;  %1259 = vmatmul.msk.f32.gmra.mxu1 %vm189_vm5, %v1699_v56 }
  0xb8   :  { %v1763_v57 = vpop.f32.mrf.mxu3 }
  0xbe   :  { %1257 = vmatmul.msk.f32.gmra.mxu0 %vm189_vm5, %v1713_v6  ;;  %1260 = vmatmul.msk.f32.gmra.mxu1 %vm189_vm5, %v1713_v6 }
 0x113   :  { %v216_v25 = vpop.f32.mrf.mxu0  ;;  %v242_v26 = vpop.f32.mrf.mxu1 }
 0x114   :  { %v243_v27 = vadd.f32 %v242_v26, %v186_v23  ;;  %v217_v28 = vadd.f32 %v216_v25, %v185_v24 }
 0x116   :  { %v251_v29 = vmax.f32 %v243_v27, 0.0 }
 0x118   :  { %v254_v30 = vadd.f32 %v251_v29, %v217_v28  ;;  %v1810_v29 = vld [vmem:[#allocation7 + $0x28] sm:$0xff] }
 0x11a   :  { %1261 = vmatmul.msk.f32.vlgmr.msrb.gmra.mxu2 %vm189_vm5, %v254_v30  ;;  %1264 = vmatmul.msk.f32.vlgmr.msrb.gmra.mxu3 %vm189_vm5, %v254_v30 }
 0x11b   :  { %1267 = vmatmul.msk.f32.vlgmr.msra.gmra.mxu0 %vm189_vm5, %v254_v30  ;;  %1270 = vmatmul.msk.f32.vlgmr.msra.gmra.mxu1 %vm189_vm5, %v254_v30  ;;  %v219_v31 = vpop.f32.mrf.mxu0  ;;  %v245_v32 = vpop.f32.mrf.mxu1  ;;  %v695_v30 = vld [vmem:[#allocation2 + $0xe0] sm:$0xff] }
 0x11c   :  { %v246_v33 = vadd.f32 %v245_v32, %v186_v23  ;;  %v220_v34 = vadd.f32 %v219_v31, %v185_v24  ;;  %v696_v31 = vld [vmem:[#allocation2 + $0xe8] sm:$0xff]  ;;  %850 = vmatpush.msrb.mxu2 %v695_v30 }
 0x11d   :  { %876 = vmatpush.msrb.mxu3 %v696_v31 }
 0x11e   :  { %v252_v35 = vmax.f32 %v246_v33, 0.0 }
 0x120   :  { %v255_v36 = vadd.f32 %v252_v35, %v220_v34 }
 0x122   :  { %1262 = vmatmul.msk.f32.gmra.mxu2 %vm189_vm5, %v255_v36  ;;  %1265 = vmatmul.msk.f32.gmra.mxu3 %vm189_vm5, %v255_v36 }
 0x123   :  { %1268 = vmatmul.msk.f32.gmra.mxu0 %vm189_vm5, %v255_v36  ;;  %1271 = vmatmul.msk.f32.gmra.mxu1 %vm189_vm5, %v255_v36  ;;  %v222_v37 = vpop.f32.mrf.mxu0  ;;  %v248_v38 = vpop.f32.mrf.mxu1 }
 0x124   :  { %v249_v40 = vadd.f32 %v248_v38, %v186_v23  ;;  %v223_v41 = vadd.f32 %v222_v37, %v185_v24  ;;  %v691_v38 = vld [vmem:[#allocation2 + $0xc0] sm:$0xff] }
 0x125   :  { %851 = vmatpush.msrb.mxu2 %v691_v38 }
 0x126   :  { %v253_v42 = vmax.f32 %v249_v40, 0.0  ;;  %v692_v40 = vld [vmem:[#allocation2 + $0xc8] sm:$0xff] }
 0x127   :  { %877 = vmatpush.msrb.mxu3 %v692_v40 }
 0x128   :  { %v256_v43 = vadd.f32 %v253_v42, %v223_v41  ;;  %v697_v41 = vld [vmem:[#allocation2 + $0xf0] sm:$0xff] }
 0x129   :  { %902 = vmatpush.msra.mxu0 %v697_v41  ;;  %878 = vmatpush.msrb.mxu3 %v688_v49 }
 0x12a   :  { %1263 = vmatmul.msk.f32.gmra.mxu2 %vm189_vm5, %v256_v43  ;;  %1266 = vmatmul.msk.f32.gmra.mxu3 %vm189_vm5, %v256_v43 }
 0x12b   :  { %1269 = vmatmul.msk.f32.gmra.mxu0 %vm189_vm5, %v256_v43  ;;  %1272 = vmatmul.msk.f32.gmra.mxu1 %vm189_vm5, %v256_v43  ;;  %v1757_v48 = vpop.f32.mrf.mxu0  ;;  %v1759_v50 = vpop.f32.mrf.mxu1  ;;  %v698_v43 = vld [vmem:[#allocation2 + $0xf8] sm:$0xff] }
 0x12c   :  { %928 = vmatpush.msra.mxu1 %v698_v43  ;;  %879 = vmatpush.msrb.mxu3 %v684_v58 }
 0x12e   :  { %929 = vmatpush.msra.mxu1 %v694_v54 }
 0x130   :  { %930 = vmatpush.msra.mxu1 %v690_v62 }
 0x132   :  { %1279 = vmatmul.msk.f32.vlgmr.msra.gmra.mxu2 %vm189_vm5, %v1767_v7  ;;  %1282 = vmatmul.msk.f32.vlgmr.msra.gmra.mxu3 %vm189_vm5, %v1767_v7 }
 0x133   :  { %v1765_v0 = vpop.f32.mrf.mxu0  ;;  %v1769_v8 = vpop.f32.mrf.mxu1  ;;  %1285 = vmatmul.msk.f32.vlgmr.msrb.gmra.mxu0 %vm189_vm5, %v1767_v7  ;;  %1288 = vmatmul.msk.f32.vlgmr.msrb.gmra.mxu1 %vm189_vm5, %v1767_v7 }
 0x134   :  { %931 = vmatpush.msra.mxu1 %v686_v3 }
 0x13a   :  { %1280 = vmatmul.msk.f32.gmra.mxu2 %vm189_vm5, %v1794_v19  ;;  %1283 = vmatmul.msk.f32.gmra.mxu3 %vm189_vm5, %v1794_v19 }
 0x13b   :  { %v1790_v16 = vpop.f32.mrf.mxu0  ;;  %1286 = vmatmul.msk.f32.gmra.mxu0 %vm189_vm5, %v1794_v19  ;;  %1289 = vmatmul.msk.f32.gmra.mxu1 %vm189_vm5, %v1794_v19  ;;  %v1804_v22 = vpop.f32.mrf.mxu1 }
 0x142   :  { %1281 = vmatmul.msk.f32.gmra.mxu2 %vm189_vm5, %v1810_v29  ;;  %1284 = vmatmul.msk.f32.gmra.mxu3 %vm189_vm5, %v1810_v29 }
 0x143   :  { %1287 = vmatmul.msk.f32.gmra.mxu0 %vm189_vm5, %v1810_v29  ;;  %1290 = vmatmul.msk.f32.gmra.mxu1 %vm189_vm5, %v1810_v29 }
 0x198   :  { %v1812_v33 = vpop.f32.mrf.mxu0  ;;  %v509_v51 = vpop.f32.mrf.mxu1 }
 0x19d   :  { %v431_v12 = vpop.f32.mrf.mxu2  ;;  %v457_v13 = vpop.f32.mrf.mxu3 }
 0x19e   :  { %v432_v14 = vadd.f32 %v431_v12, %v318_v44  ;;  %v458_v15 = vadd.f32 %v457_v13, %v344_v45 }
 0x1a0   :  { %v528_v17 = vadd.f32 %v1785_v10, %v432_v14  ;;  %v529_v18 = vadd.f32 %v1788_v11, %v458_v15  ;;  %v486_v13 = vpop.f32.mrf.mxu0  ;;  %v1838_v14 = vperm.slane %v1778_v9, 2  ;;  %v1841_v15 = vperm.slane %v1778_v9, 3 }
 0x1a1   :  { %v487_v9 = vadd.f32 %v486_v13, %v1765_v0 }
 0x1a2   :  { %v1273_v20 = vmul.f32 -1.442695, %v528_v17  ;;  %v1276_v21 = vmul.f32 -1.442695, %v529_v18  ;;  %v484_v18 = vadd.f32 %v1812_v33, %v1757_v48 }
 0x1a3   :  { %v534_v38 = vadd.f32 %v1838_v14, %v487_v9 }
 0x1a4   :  { %1332 = vpow2.f32 %v1273_v20  ;;  %v510_v20 = vadd.f32 %v509_v51, %v1759_v50  ;;  %v530_v48 = vadd.f32 %v1838_v14, %v484_v18 }
 0x1a5   :  { %1334 = vpow2.f32 %v1276_v21  ;;  %v434_v23 = vpop.f32.mrf.mxu2  ;;  %v460_v24 = vpop.f32.mrf.mxu3 }
 0x1a6   :  { %v435_v25 = vadd.f32 %v434_v23, %v1753_v46  ;;  %v461_v26 = vadd.f32 %v460_v24, %v1755_v47  ;;  %v687_v46 = vld [vmem:[#allocation2 + $0xa0] sm:$0xff]  ;;  %v693_v47 = vld [vmem:[#allocation2 + $0xd0] sm:$0xff]  ;;  %v531_v33 = vadd.f32 %v1841_v15, %v510_v20 }
 0x1a7   :  { %852 = vmatpush.msrb.mxu2 %v687_v46  ;;  %903 = vmatpush.msra.mxu0 %v693_v47 }
 0x1a8   :  { %v532_v27 = vadd.f32 %v1785_v10, %v435_v25  ;;  %v533_v28 = vadd.f32 %v1788_v11, %v461_v26  ;;  %v489_v46 = vpop.f32.mrf.mxu0 }
 0x1a9   :  { %853 = vmatpush.msrb.mxu2 %v683_v53  ;;  %904 = vmatpush.msra.mxu0 %v689_v60  ;;  %v490_v62 = vadd.f32 %v489_v46, %v1790_v16 }
 0x1aa   :  { %v1333_v32 = vpop.eup %1332  ;;  %v1274_v34 = vmul.f32 -1.442695, %v532_v27  ;;  %v1277_v37 = vmul.f32 -1.442695, %v533_v28  ;;  %v512_v28 = vpop.f32.mrf.mxu1 }
 0x1ab   :  { %v1335_v35 = vpop.eup %1334  ;;  %v1814_v36 = vadd.f32 1.0, %v1333_v32 }
 0x1ac   :  { %v1820_v42 = vadd.f32 1.0, %v1335_v35  ;;  %1336 = vpow2.f32 %v1274_v34  ;;  %v513_v34 = vadd.f32 %v512_v28, %v1769_v8 }
 0x1ad   :  { %1338 = vrcp.f32 %v1814_v36  ;;  %v437_v44 = vpop.f32.mrf.mxu2  ;;  %v463_v45 = vpop.f32.mrf.mxu3  ;;  %v563_v24 = vand.u32 2147483648, %v1814_v36  ;;  %v561_v27 = vand.u32 2147483647, %v1814_v36  ;;  %vm557_vm11 = vweird.f32 %v1814_v36 }
 0x1ae   :  { %1340 = vrcp.f32 %v1820_v42  ;;  %v438_v52 = vadd.f32 %v437_v44, %v1761_v55  ;;  %v464_v59 = vadd.f32 %v463_v45, %v1763_v57  ;;  %v685_v55 = vld [vmem:[#allocation2 + $0x90] sm:$0xff]  ;;  %vm614_vm15 = vweird.f32 %v1820_v42 }
 0x1af   :  { %1342 = vpow2.f32 %v1277_v37  ;;  %905 = vmatpush.msra.mxu0 %v685_v55  ;;  %v564_v0 = vor.u32 1.1754944e-38, %v563_v24  ;;  %vm562_vm13 = vcmp.eq.f32.partialorder %v561_v27, 8.507059e+37  ;;  %v618_v53 = vand.u32 2147483647, %v1820_v42 }
 0x1b0   :  { %v536_v61 = vadd.f32 %v1785_v10, %v438_v52  ;;  %v537_v63 = vadd.f32 %v1788_v11, %v464_v59  ;;  %v535_v60 = vadd.f32 %v1841_v15, %v513_v34 }
 0x1b1   :  { %vm619_vm4 = vcmp.eq.f32.partialorder %v618_v53, 8.507059e+37 }
 0x1b2   :  { %v1337_v1 = vpop.eup %1336  ;;  %v1275_v2 = vmul.f32 -1.442695, %v536_v61  ;;  %v1278_v57 = vmul.f32 -1.442695, %v537_v63 }
 0x1b3   :  { %v1339_v4 = vpop.eup %1338  ;;  %v1832_v5 = vadd.f32 1.0, %v1337_v1 }
 0x1b4   :  { %v1834_v12 = vpop.eup %1340  ;;  %v553_v10 = vmul.f32 %v1339_v4, %v1814_v36  ;;  %1344 = vpow2.f32 %v1275_v2  ;;  %vm558_vm10 = vweird.f32 %v1339_v4  ;;  %v620_v36 = vand.u32 2147483648, %v1820_v42 }
 0x1b5   :  { %v1343_v11 = vpop.eup %1342  ;;  %v610_v17 = vmul.f32 %v1834_v12, %v1820_v42  ;;  %1346 = vrcp.f32 %v1832_v5  ;;  %vm559_vm12 = vmor %vm557_vm11, %vm558_vm10  ;;  %vm615_vm14 = vweird.f32 %v1834_v12  ;;  %v578_v51 = vand.u32 2147483648, %v1832_v5 }
 0x1b6   :  { %v554_v21 = vsub.f32 1.0, %v553_v10  ;;  %v1849_v23 = vadd.f32 1.0, %v1343_v11  ;;  %1348 = vpow2.f32 %v1278_v57  ;;  %v576_v58 = vand.u32 2147483647, %v1832_v5  ;;  %vm1881_vm1 = vmor %vm614_vm15, %vm615_vm14  ;;  %v515_v57 = vpop.f32.mrf.mxu1 }
 0x1b7   :  { %v611_v25 = vsub.f32 1.0, %v610_v17  ;;  %v621_v55 = vor.u32 1.1754944e-38, %v620_v36  ;;  %vm572_vm2 = vweird.f32 %v1832_v5  ;;  %v579_v3 = vor.u32 1.1754944e-38, %v578_v51 }
 0x1b8   :  { %v555_v26 = vmul.f32 %v1339_v4, %v554_v21  ;;  %1350 = vrcp.f32 %v1849_v23  ;;  %vm577_vm6 = vcmp.eq.f32.partialorder %v576_v58, 8.507059e+37  ;;  %v635_v16 = vand.u32 2147483648, %v1849_v23 }
 0x1b9   :  { %v612_v31 = vmul.f32 %v1834_v12, %v611_v25  ;;  %vm629_vm8 = vweird.f32 %v1849_v23  ;;  %v516_v20 = vadd.f32 %v515_v57, %v1804_v22 }
 0x1ba   :  { %v1345_v30 = vpop.eup %1344  ;;  %v556_v50 = vadd.f32 %v1339_v4, %v555_v26  ;;  %v633_v26 = vand.u32 2147483647, %v1849_v23 }
 0x1bb   :  { %v1347_v32 = vpop.eup %1346  ;;  %v1860_v35 = vadd.f32 1.0, %v1345_v30  ;;  %v613_v49 = vadd.f32 %v1834_v12, %v612_v31  ;;  %v636_v31 = vor.u32 1.1754944e-38, %v635_v16  ;;  %v539_v34 = vadd.f32 %v1841_v15, %v516_v20 }
 0x1bc   :  { %v560_v37 = vsel %vm559_vm12, %v1339_v4, %v556_v50  ;;  %v568_v40 = vmul.f32 %v1347_v32, %v1832_v5  ;;  %v1349_v41 = vpop.eup %1348  ;;  %vm573_vm0 = vweird.f32 %v1347_v32 }
 0x1bd   :  { %v565_v43 = vsel %vm562_vm13, %v564_v0, %v560_v37  ;;  %1352 = vrcp.f32 %v1860_v35  ;;  %v1869_v47 = vadd.f32 1.0, %v1349_v41  ;;  %v617_v1 = vsel %vm1881_vm1, %v1834_v12, %v613_v49  ;;  %vm574_vm3 = vmor %vm572_vm2, %vm573_vm0 }
 0x1be   :  { %v1867_v44 = vpop.eup %1350  ;;  %v654_v45 = vmul.f32 %v565_v43, %v531_v33  ;;  %v569_v8 = vsub.f32 1.0, %v568_v40  ;;  %v622_v5 = vsel %vm619_vm4, %v621_v55, %v617_v1  ;;  %v591_v24 = vand.u32 2147483647, %v1860_v35  ;;  %v1930_v1 = vpop.f32.mrf.mxu0 }
 0x1bf   :  { %v625_v52 = vmul.f32 %v1867_v44, %v1849_v23  ;;  %1354 = vrcp.f32 %v1869_v47  ;;  %vm630_vm7 = vweird.f32 %v1867_v44  ;;  %v593_v25 = vand.u32 2147483648, %v1860_v35 }
 0x1c0   :  { %v570_v54 = vmul.f32 %v1347_v32, %v569_v8  ;;  %v657_v63 = vadd.f32 %v654_v45, %v530_v48  ;;  %vm1902_vm9 = vmor %vm629_vm8, %vm630_vm7  ;;  %v663_v30 = vsub.f32 1.0, %v622_v5  ;;  %vm587_vm11 = vweird.f32 %v1860_v35 }
 0x1c1   :  { %v626_v61 = vsub.f32 1.0, %v625_v52  ;;  %v669_v23 = vmul.f32 %v622_v5, %v1677_v39  ;;  %v594_v37 = vor.u32 1.1754944e-38, %v593_v25  ;;  %vm634_vm13 = vcmp.eq.f32.partialorder %v633_v26, 8.507059e+37 }
 0x1c2   :  { %v571_v42 = vadd.f32 %v1347_v32, %v570_v54  ;;  %1356 = vtanh.f32 %v657_v63  ;;  %vm592_vm14 = vcmp.eq.f32.partialorder %v591_v24, 8.507059e+37  ;;  %v650_v8 = vand.u32 2147483648, %v1869_v47  ;;  %v768_v63 = vpop.f32.mrf.mxu3 }
 0x1c3   :  { %v1353_v2 = vpop.eup %1352  ;;  %v627_v4 = vmul.f32 %v1867_v44, %v626_v61  ;;  %vm644_vm0 = vweird.f32 %v1869_v47  ;;  %v648_v15 = vand.u32 2147483647, %v1869_v47 }
 0x1c4   :  { %v575_v10 = vsel %vm574_vm3, %v1347_v32, %v571_v42  ;;  %v583_v13 = vmul.f32 %v1353_v2, %v1860_v35  ;;  %vm588_vm10 = vweird.f32 %v1353_v2  ;;  %v651_v53 = vor.u32 1.1754944e-38, %v650_v8 }
 0x1c5   :  { %v580_v11 = vsel %vm577_vm6, %v579_v3, %v575_v10  ;;  %v628_v12 = vadd.f32 %v1867_v44, %v627_v4  ;;  %v1355_v17 = vpop.eup %1354  ;;  %vm589_vm12 = vmor %vm587_vm11, %vm588_vm10  ;;  %vm649_vm2 = vcmp.eq.f32.partialorder %v648_v15, 8.507059e+37  ;;  %v1303_v10 = vld [vmem:[%s2087_s8 + $0x4] sm:$0xf] }
 0x1c6   :  { %v655_v18 = vmul.f32 %v580_v11, %v535_v60  ;;  %v584_v21 = vsub.f32 1.0, %v583_v13  ;;  %v640_v9 = vmul.f32 %v1355_v17, %v1869_v47  ;;  %vm645_vm15 = vweird.f32 %v1355_v17  ;;  %v1934_v4 = vpop.f32.mrf.mxu0 }
 0x1c7   :  { %v632_v32 = vsel %vm1902_vm9, %v1867_v44, %v628_v12  ;;  %v538_v44 = vadd.f32 %v1838_v14, %v490_v62  ;;  %vm646_vm1 = vmor %vm644_vm0, %vm645_vm15  ;;  %v742_v62 = vpop.f32.mrf.mxu2  ;;  %v945_v16 = vperm.slane %v1303_v10, 0  ;;  %v946_v13 = vperm.slane %v1303_v10, 1 }
 0x1c8   :  { %v585_v28 = vmul.f32 %v1353_v2, %v584_v21  ;;  %v658_v48 = vadd.f32 %v655_v18, %v534_v38  ;;  %v1357_v50 = vpop.eup %1356  ;;  %v641_v22 = vsub.f32 1.0, %v640_v9  ;;  %v637_v35 = vsel %vm634_vm13, %v636_v31, %v632_v32  ;;  %v1107_v31 = vld [vmem:[%s2089_s10 + $0x18] sm:$0xff] }
 0x1c9   :  { %v666_v0 = vmul.f32 %v1357_v50, %v663_v30  ;;  %v664_v39 = vsub.f32 1.0, %v637_v35  ;;  %v670_v51 = vmul.f32 %v637_v35, %v1699_v56  ;;  %1133 = vmatpush.msra.mxu2 %v1107_v31 }
 0x1ca   :  { %v586_v33 = vadd.f32 %v1353_v2, %v585_v28  ;;  %1358 = vtanh.f32 %v658_v48  ;;  %v642_v40 = vmul.f32 %v1355_v17, %v641_v22  ;;  %v771_v42 = vpop.f32.mrf.mxu3 }
 0x1cb   :  { %v672_v41 = vadd.f32 %v669_v23, %v666_v0  ;;  %v1106_v0 = vld [vmem:[%s2089_s10 + $0x10] sm:$0xff] }
 0x1cc   :  { %v590_v38 = vsel %vm589_vm12, %v1353_v2, %v586_v33  ;;  %v643_v36 = vadd.f32 %v1355_v17, %v642_v40  ;;  %v1932_v2 = vpop.f32.mrf.mxu1  ;;  %v1105_v40 = vld [vmem:[%s2089_s10 + $0x8] sm:$0xff]  ;;  %1134 = vmatpush.msra.mxu2 %v1106_v0 }
 0x1cd   :  { %v595_v43 = vsel %vm592_vm14, %v594_v37, %v590_v38  ;;  %1291 = vmatmul.msk.f32.vlgmr.msrb.gmra.mxu2 %vm189_vm5, %v672_v41  ;;  %675 = vst [vmem:[#allocation8] sm:$0xff] %v672_v41  ;;  %1294 = vmatmul.msk.f32.vlgmr.msrb.gmra.mxu3 %vm189_vm5, %v672_v41 }
 0x1ce   :  { %v656_v45 = vmul.f32 %v595_v43, %v539_v34  ;;  %1297 = vmatmul.msk.f32.vlgmr.msra.gmra.mxu0 %vm189_vm5, %v672_v41  ;;  %1300 = vmatmul.msk.f32.vlgmr.msra.gmra.mxu1 %vm189_vm5, %v672_v41  ;;  %v647_v52 = vsel %vm646_vm1, %v1355_v17, %v643_v36  ;;  %v1941_v18 = vpop.f32.mrf.mxu0  ;;  %v1104_v43 = vld [vmem:[%s2089_s10] sm:$0xff] }
 0x1cf   :  { %v652_v58 = vsel %vm649_vm2, %v651_v53, %v647_v52  ;;  %v745_v55 = vpop.f32.mrf.mxu2  ;;  %1135 = vmatpush.msra.mxu2 %v1105_v40 }
 0x1d0   :  { %v1359_v46 = vpop.eup %1358  ;;  %v659_v14 = vadd.f32 %v656_v45, %v538_v44  ;;  %v665_v47 = vsub.f32 1.0, %v652_v58  ;;  %v671_v56 = vmul.f32 %v652_v58, %v1713_v6 }
 0x1d1   :  { %v667_v49 = vmul.f32 %v1359_v46, %v664_v39  ;;  %1136 = vmatpush.msra.mxu2 %v1104_v43 }
 0x1d2   :  { %1360 = vtanh.f32 %v659_v14  ;;  %v774_v6 = vpop.f32.mrf.mxu3 }
 0x1d3   :  { %v673_v54 = vadd.f32 %v670_v51, %v667_v49 }
 0x1d4   :  { %v1936_v57 = vpop.f32.mrf.mxu1 }
 0x1d5   :  { %676 = vst [vmem:[#allocation8 + $0x8] sm:$0xff] %v673_v54  ;;  %1292 = vmatmul.msk.f32.gmra.mxu2 %vm189_vm5, %v673_v54  ;;  %1295 = vmatmul.msk.f32.gmra.mxu3 %vm189_vm5, %v673_v54 }
 0x1d6   :  { %1298 = vmatmul.msk.f32.gmra.mxu0 %vm189_vm5, %v673_v54  ;;  %1301 = vmatmul.msk.f32.gmra.mxu1 %vm189_vm5, %v673_v54 }
 0x1d7   :  { %v748_v3 = vpop.f32.mrf.mxu2 }
 0x1d8   :  { %v1361_v59 = vpop.eup %1360 }
 0x1d9   :  { %v668_v60 = vmul.f32 %v1361_v59, %v665_v47  ;;  %v1964_v47 = vperm.slane %v1303_v10, 2  ;;  %v1966_v59 = vperm.slane %v1303_v10, 3 }
 0x1db   :  { %v674_v61 = vadd.f32 %v671_v56, %v668_v60 }
 0x1dc   :  { %v1943_v9 = vpop.f32.mrf.mxu1 }
 0x1dd   :  { %677 = vst [vmem:[#allocation8 + $0x10] sm:$0xff] %v674_v61  ;;  %1293 = vmatmul.msk.f32.gmra.mxu2 %vm189_vm5, %v674_v61  ;;  %1296 = vmatmul.msk.f32.gmra.mxu3 %vm189_vm5, %v674_v61 }
 0x1de   :  { %1299 = vmatmul.msk.f32.gmra.mxu0 %vm189_vm5, %v674_v61  ;;  %1302 = vmatmul.msk.f32.gmra.mxu1 %vm189_vm5, %v674_v61 }
 0x24b   :  { %v907_v32 = vpop.f32.mrf.mxu0  ;;  %v933_v36 = vpop.f32.mrf.mxu1 }
 0x24c   :  { %v908_v56 = vadd.f32 %v907_v32, %v1930_v1  ;;  %v934_v61 = vadd.f32 %v933_v36, %v1932_v2  ;;  %v1153_v32 = vld [vmem:[%s2091_s12 + $0x18] sm:$0xff] }
 0x24d   :  { %1179 = vmatpush.msra.mxu3 %v1153_v32 }
 0x250   :  { %v855_v11 = vpop.f32.mrf.mxu2  ;;  %v881_v5 = vpop.f32.mrf.mxu3 }
 0x251   :  { %v856_v12 = vadd.f32 %v855_v11, %v742_v62  ;;  %v882_v17 = vadd.f32 %v881_v5, %v768_v63  ;;  %v955_v11 = vadd.f32 %v1964_v47, %v908_v56 }
 0x253   :  { %v953_v20 = vadd.f32 %v945_v16, %v856_v12  ;;  %v954_v21 = vadd.f32 %v946_v13, %v882_v17  ;;  %v910_v54 = vpop.f32.mrf.mxu0  ;;  %v956_v12 = vadd.f32 %v1966_v59, %v934_v61 }
 0x255   :  { %v1304_v24 = vmul.f32 -1.442695, %v953_v20  ;;  %v1307_v25 = vmul.f32 -1.442695, %v954_v21 }
 0x257   :  { %1362 = vpow2.f32 %v1304_v24 }
 0x258   :  { %1364 = vpow2.f32 %v1307_v25  ;;  %v858_v26 = vpop.f32.mrf.mxu2  ;;  %v884_v27 = vpop.f32.mrf.mxu3 }
 0x259   :  { %v859_v28 = vadd.f32 %v858_v26, %v745_v55  ;;  %v885_v30 = vadd.f32 %v884_v27, %v771_v42 }
 0x25b   :  { %v957_v48 = vadd.f32 %v945_v16, %v859_v28  ;;  %v958_v50 = vadd.f32 %v946_v13, %v885_v30 }
 0x25d   :  { %v1363_v22 = vpop.eup %1362  ;;  %v1305_v33 = vmul.f32 -1.442695, %v957_v48  ;;  %v1308_v37 = vmul.f32 -1.442695, %v958_v50  ;;  %v913_v50 = vpop.f32.mrf.mxu0 }
 0x25e   :  { %v1365_v23 = vpop.eup %1364  ;;  %v974_v34 = vadd.f32 1.0, %v1363_v22 }
 0x25f   :  { %v1954_v38 = vadd.f32 1.0, %v1365_v23  ;;  %1366 = vpow2.f32 %v1305_v33  ;;  %v1152_v33 = vld [vmem:[%s2091_s12 + $0x10] sm:$0xff] }
 0x260   :  { %1368 = vrcp.f32 %v974_v34  ;;  %v861_v41 = vpop.f32.mrf.mxu2  ;;  %v887_v35 = vpop.f32.mrf.mxu3  ;;  %v988_v55 = vand.u32 2147483648, %v974_v34  ;;  %v986_v10 = vand.u32 2147483647, %v974_v34  ;;  %vm982_vm4 = vweird.f32 %v974_v34  ;;  %1180 = vmatpush.msra.mxu3 %v1152_v33 }
 0x261   :  { %1370 = vrcp.f32 %v1954_v38  ;;  %v862_v44 = vadd.f32 %v861_v41, %v748_v3  ;;  %v888_v45 = vadd.f32 %v887_v35, %v774_v6  ;;  %v911_v3 = vadd.f32 %v910_v54, %v1934_v4  ;;  %v1151_v41 = vld [vmem:[%s2091_s12 + $0x8] sm:$0xff] }
 0x262   :  { %1372 = vpow2.f32 %v1308_v37  ;;  %v989_v17 = vor.u32 1.1754944e-38, %v988_v55  ;;  %vm987_vm7 = vcmp.eq.f32.partialorder %v986_v10, 8.507059e+37  ;;  %v1045_v28 = vand.u32 2147483648, %v1954_v38  ;;  %1181 = vmatpush.msra.mxu3 %v1151_v41 }
 0x263   :  { %v961_v8 = vadd.f32 %v945_v16, %v862_v44  ;;  %v962_v39 = vadd.f32 %v946_v13, %v888_v45  ;;  %v936_v16 = vpop.f32.mrf.mxu1  ;;  %v1984_v24 = vadd.f32 %v1964_v47, %v911_v3  ;;  %vm1039_vm9 = vweird.f32 %v1954_v38 }
 0x264   :  { %v937_v4 = vadd.f32 %v936_v16, %v1936_v57  ;;  %v1046_v45 = vor.u32 1.1754944e-38, %v1045_v28 }
 0x265   :  { %v1367_v15 = vpop.eup %1366  ;;  %v1306_v46 = vmul.f32 -1.442695, %v961_v8  ;;  %v1309_v51 = vmul.f32 -1.442695, %v962_v39 }
 0x266   :  { %v1369_v14 = vpop.eup %1368  ;;  %v1960_v49 = vadd.f32 1.0, %v1367_v15  ;;  %v960_v43 = vadd.f32 %v1966_v59, %v937_v4  ;;  %v1150_v15 = vld [vmem:[%s2091_s12] sm:$0xff] }
 0x267   :  { %v1962_v52 = vpop.eup %1370  ;;  %v978_v53 = vmul.f32 %v1369_v14, %v974_v34  ;;  %1374 = vpow2.f32 %v1306_v46  ;;  %vm983_vm3 = vweird.f32 %v1369_v14  ;;  %v1043_v34 = vand.u32 2147483647, %v1954_v38  ;;  %1182 = vmatpush.msra.mxu3 %v1150_v15 }
 0x268   :  { %v1373_v58 = vpop.eup %1372  ;;  %v1035_v60 = vmul.f32 %v1962_v52, %v1954_v38  ;;  %1376 = vrcp.f32 %v1960_v49  ;;  %vm984_vm6 = vmor %vm982_vm4, %vm983_vm3  ;;  %vm1040_vm8 = vweird.f32 %v1962_v52  ;;  %v1003_v0 = vand.u32 2147483648, %v1960_v49 }
 0x269   :  { %v979_v62 = vsub.f32 1.0, %v978_v53  ;;  %v1973_v63 = vadd.f32 1.0, %v1373_v58  ;;  %1378 = vpow2.f32 %v1309_v51  ;;  %v1001_v40 = vand.u32 2147483647, %v1960_v49  ;;  %vm2013_vm11 = vmor %vm1039_vm9, %vm1040_vm8 }
 0x26a   :  { %v1036_v42 = vsub.f32 1.0, %v1035_v60  ;;  %v914_v38 = vadd.f32 %v913_v50, %v1941_v18  ;;  %vm997_vm12 = vweird.f32 %v1960_v49  ;;  %vm1044_vm14 = vcmp.eq.f32.partialorder %v1043_v34, 8.507059e+37 }
 0x26b   :  { %v980_v6 = vmul.f32 %v1369_v14, %v979_v62  ;;  %1380 = vrcp.f32 %v1973_v63  ;;  %v939_v18 = vpop.f32.mrf.mxu1  ;;  %vm1002_vm15 = vcmp.eq.f32.partialorder %v1001_v40, 8.507059e+37  ;;  %vm1054_vm1 = vweird.f32 %v1973_v63 }
 0x26c   :  { %v1037_v2 = vmul.f32 %v1962_v52, %v1036_v42  ;;  %v940_v61 = vadd.f32 %v939_v18, %v1943_v9  ;;  %v1058_v10 = vand.u32 2147483647, %v1973_v63 }
 0x26d   :  { %v1375_v13 = vpop.eup %1374  ;;  %v981_v1 = vadd.f32 %v1369_v14, %v980_v6 }
 0x26e   :  { %v1377_v5 = vpop.eup %1376  ;;  %v1981_v20 = vadd.f32 1.0, %v1375_v13  ;;  %v1038_v22 = vadd.f32 %v1962_v52, %v1037_v2 }
 0x26f   :  { %v985_v21 = vsel %vm984_vm6, %v1369_v14, %v981_v1  ;;  %v993_v25 = vmul.f32 %v1377_v5, %v1960_v49  ;;  %v1379_v26 = vpop.eup %1378  ;;  %vm998_vm10 = vweird.f32 %v1377_v5  ;;  %v1004_v14 = vor.u32 1.1754944e-38, %v1003_v0 }
 0x270   :  { %v990_v27 = vsel %vm987_vm7, %v989_v17, %v985_v21  ;;  %1382 = vrcp.f32 %v1981_v20  ;;  %v1992_v31 = vadd.f32 1.0, %v1379_v26  ;;  %v1042_v39 = vsel %vm2013_vm11, %v1962_v52, %v1038_v22  ;;  %vm999_vm13 = vmor %vm997_vm12, %vm998_vm10 }
 0x271   :  { %v1990_v30 = vpop.eup %1380  ;;  %v1079_v57 = vmul.f32 %v990_v27, %v956_v12  ;;  %v994_v48 = vsub.f32 1.0, %v993_v25  ;;  %v1060_v52 = vand.u32 2147483648, %v1973_v63  ;;  %v1047_v54 = vsel %vm1044_vm14, %v1046_v45, %v1042_v39 }
 0x272   :  { %v1050_v23 = vmul.f32 %v1990_v30, %v1973_v63  ;;  %1384 = vrcp.f32 %v1992_v31  ;;  %vm1055_vm0 = vweird.f32 %v1990_v30  ;;  %v1016_v42 = vand.u32 2147483647, %v1981_v20 }
 0x273   :  { %v995_v37 = vmul.f32 %v1377_v5, %v994_v48  ;;  %v1082_v36 = vadd.f32 %v1079_v57, %v955_v11  ;;  %v1018_v3 = vand.u32 2147483648, %v1981_v20  ;;  %v1088_v13 = vsub.f32 1.0, %v1047_v54  ;;  %vm2038_vm3 = vmor %vm1054_vm1, %vm1055_vm0 }
 0x274   :  { %v1051_v44 = vsub.f32 1.0, %v1050_v23  ;;  %vm1012_vm4 = vweird.f32 %v1981_v20  ;;  %v1094_v4 = vmul.f32 %v1047_v54, %v1767_v7  ;;  %v964_v21 = vadd.f32 %v1966_v59, %v940_v61 }
 0x275   :  { %v996_v8 = vadd.f32 %v1377_v5, %v995_v37  ;;  %1386 = vtanh.f32 %v1082_v36  ;;  %v1019_v25 = vor.u32 1.1754944e-38, %v1018_v3  ;;  %vm1059_vm7 = vcmp.eq.f32.partialorder %v1058_v10, 8.507059e+37 }
 0x276   :  { %v1383_v46 = vpop.eup %1382  ;;  %v1052_v51 = vmul.f32 %v1990_v30, %v1051_v44  ;;  %vm1017_vm8 = vcmp.eq.f32.partialorder %v1016_v42, 8.507059e+37  ;;  %v1075_v7 = vand.u32 2147483648, %v1992_v31  ;;  %vm1069_vm10 = vweird.f32 %v1992_v31 }
 0x277   :  { %v1008_v49 = vmul.f32 %v1383_v46, %v1981_v20  ;;  %v1000_v53 = vsel %vm999_vm13, %v1377_v5, %v996_v8  ;;  %vm1013_vm2 = vweird.f32 %v1383_v46  ;;  %v1061_v5 = vor.u32 1.1754944e-38, %v1060_v52 }
 0x278   :  { %v1005_v58 = vsel %vm1002_vm15, %v1004_v14, %v1000_v53  ;;  %v1053_v60 = vadd.f32 %v1990_v30, %v1052_v51  ;;  %v1385_v56 = vpop.eup %1384  ;;  %vm1014_vm6 = vmor %vm1012_vm4, %vm1013_vm2  ;;  %v1073_v50 = vand.u32 2147483647, %v1992_v31  ;;  %v1076_v34 = vor.u32 1.1754944e-38, %v1075_v7  ;;  %v1331_v14 = vld [vmem:[%s2092_s13] ss:$0 sm:$0xff] }
 0x279   :  { %v1009_v62 = vsub.f32 1.0, %v1008_v49  ;;  %v1080_v55 = vmul.f32 %v1005_v58, %v960_v43  ;;  %v1065_v6 = vmul.f32 %v1385_v56, %v1992_v31  ;;  %vm1070_vm9 = vweird.f32 %v1385_v56 }
 0x27a   :  { %v1057_v2 = vsel %vm2038_vm3, %v1990_v30, %v1053_v60  ;;  %v963_v30 = vadd.f32 %v1964_v47, %v914_v38  ;;  %vm1071_vm11 = vmor %vm1069_vm10, %vm1070_vm9  ;;  %vm1074_vm12 = vcmp.eq.f32.partialorder %v1073_v50, 8.507059e+37 }
 0x27b   :  { %v1010_v16 = vmul.f32 %v1383_v46, %v1009_v62  ;;  %v1083_v9 = vadd.f32 %v1080_v55, %v1984_v24  ;;  %v1387_v1 = vpop.eup %1386  ;;  %v1066_v12 = vsub.f32 1.0, %v1065_v6  ;;  %v1062_v20 = vsel %vm1059_vm7, %v1061_v5, %v1057_v2 }
 0x27c   :  { %v1091_v63 = vmul.f32 %v1387_v1, %v1088_v13  ;;  %v1089_v59 = vsub.f32 1.0, %v1062_v20  ;;  %v1095_v0 = vmul.f32 %v1062_v20, %v1794_v19  ;;  %v1330_v19 = vld [vmem:[%s2090_s11] ss:$0 sm:$0xff]  ;;  %s1529_s11 = smov [#allocation8]  }
 0x27d   :  { %v1011_v17 = vadd.f32 %v1383_v46, %v1010_v16  ;;  %1388 = vtanh.f32 %v1083_v9  ;;  %v1067_v24 = vmul.f32 %v1385_v56, %v1066_v12  ;;  %s1200_s5 = sshll.u32 %s1529_s11, 4  ;;  %s1201_s5 = int_to_ptr.vmem [resolvable:$true] %s1200_s5 }
 0x27e   :  { %v1097_v26 = vadd.f32 %v1094_v4, %v1091_v63 }
 0x27f   :  { %v1015_v27 = vsel %vm1014_vm6, %v1383_v46, %v1011_v17  ;;  %v1068_v57 = vadd.f32 %v1385_v56, %v1067_v24 }
 0x280   :  { %v1020_v28 = vsel %vm1017_vm8, %v1019_v25, %v1015_v27  ;;  %1101 = vst [vmem:[#allocation8 + $0x18] sm:$0xff] %v1097_v26  ;;  %1310 = vmatmul.msk.f32.vlgmr.msra.gmra.mxu2 %vm189_vm5, %v1097_v26 }
 0x281   :  { %v1081_v48 = vmul.f32 %v1020_v28, %v964_v21  ;;  %v1072_v23 = vsel %vm1071_vm11, %v1385_v56, %v1068_v57 }
 0x282   :  { %v1077_v37 = vsel %vm1074_vm12, %v1076_v34, %v1072_v23 }
 0x283   :  { %v1389_v22 = vpop.eup %1388  ;;  %v1084_v32 = vadd.f32 %v1081_v48, %v963_v30  ;;  %v1090_v40 = vsub.f32 1.0, %v1077_v37  ;;  %v1096_v31 = vmul.f32 %v1077_v37, %v1810_v29 }
 0x284   :  { %v1092_v33 = vmul.f32 %v1389_v22, %v1089_v59 }
 0x285   :  { %1390 = vtanh.f32 %v1084_v32 }
 0x286   :  { %v1098_v47 = vadd.f32 %v1095_v0, %v1092_v33 }
 0x288   :  { %1102 = vst [vmem:[#allocation8 + $0x20] sm:$0xff] %v1098_v47  ;;  %1311 = vmatmul.msk.f32.gmra.mxu2 %vm189_vm5, %v1098_v47 }
 0x28b   :  { %v1391_v41 = vpop.eup %1390 }
 0x28c   :  { %v1093_v35 = vmul.f32 %v1391_v41, %v1090_v40 }
 0x28e   :  { %v1099_v43 = vadd.f32 %v1096_v31, %v1093_v35 }
 0x290   :  { %1103 = vst [vmem:[#allocation8 + $0x28] sm:$0xff] %v1099_v43  ;;  %1312 = vmatmul.msk.f32.gmra.mxu2 %vm189_vm5, %v1099_v43 }
 0x291   :  { %1208 = dma.vmem_to_hbm [thread:$0]  %s1201_s5, 768, %s1203_s23, [#allocation4], %s1525_s19, %s1525_s19, %s1526_s21  }
 0x303   :  { %v1138_v38 = vpop.f32.mrf.mxu2 }
 0x304   :  { %v1139_v36 = vadd.f32 %v1330_v19, %v1138_v38 }
 0x306   :  { %v1147_v44 = vmax.f32 %v1139_v36, 0.0 }
 0x308   :  { %1313 = vmatmul.msk.f32.vlgmr.msra.gmra.mxu3 %vm189_vm5, %v1147_v44 }
 0x30b   :  { %v1141_v45 = vpop.f32.mrf.mxu2 }
 0x30c   :  { %v1142_v8 = vadd.f32 %v1330_v19, %v1141_v45 }
 0x30e   :  { %v1148_v39 = vmax.f32 %v1142_v8, 0.0 }
 0x310   :  { %1314 = vmatmul.msk.f32.gmra.mxu3 %vm189_vm5, %v1148_v39 }
 0x313   :  { %v1144_v15 = vpop.f32.mrf.mxu2 }
 0x314   :  { %v1145_v29 = vadd.f32 %v1330_v19, %v1144_v15 }
 0x316   :  { %v1149_v46 = vmax.f32 %v1145_v29, 0.0 }
 0x318   :  { %1315 = vmatmul.msk.f32.gmra.mxu3 %vm189_vm5, %v1149_v46 }
 0x38b   :  { %v1184_v18 = vpop.f32.mrf.mxu3 }
 0x38c   :  { %v1185_v51 = vadd.f32 %v1331_v14, %v1184_v18 }
 0x38e   :  { %1193 = vst [vmem:[#allocation9] sm:$0xff] %v1185_v51 }
 0x393   :  { %v1187_v49 = vpop.f32.mrf.mxu3 }
 0x394   :  { %v1188_v53 = vadd.f32 %v1331_v14, %v1187_v49 }
 0x396   :  { %1194 = vst [vmem:[#allocation9 + $0x8] sm:$0xff] %v1188_v53 }
 0x39b   :  { %v1190_v52 = vpop.f32.mrf.mxu3 }
 0x39c   :  { %v1191_v54 = vadd.f32 %v1331_v14, %v1190_v52 }
 0x39e   :  { %1195 = vst [vmem:[#allocation9 + $0x10] sm:$0xff] %v1191_v54 }
 0x39f   :  { %1221 = dma.vmem_to_hbm [thread:$0]  %s1214_s14, 384, %s1216_s26, [#allocation10], %s1525_s19, %s1525_s19, %s1526_s21  }
 0x3a0   :  { %1516 = dma.done.wait [#allocation4], 768  }
 0x3a1   :  { %1517 = vsyncadd [#allocation4], 4294966528 }
 0x3a2   :  { %1518 = dma.done.wait [#allocation10], 384  }
 0x3a3   :  { %1519 = vsyncadd [#allocation10], 4294966912 }
 0x3a4   :  { %1230 = vsyncpa [#allocation3], 1 }
 0x3a5   :  { %1231 = vsyncpa [#allocation6], 1 }
 0x3a6   :  { %1232 = vsyncpa [#allocation4], 1 }
 0x3a7   :  { %1233 = vsyncpa [#allocation10], 1 }

</bundles_post_ra>
